<compile_context>
chip_gen: v7x
topology: tpu7x:2x2x1
jax: 0.10.0
libtpu: 0.0.40
codegen_flags: <defaults>
</compile_context>

<pallas_src>
import jax
import jax.numpy as jnp
from jax.experimental import pallas as pl
from jax.experimental.pallas import tpu as pltpu

ALPHA = 0.001
WIN = 11
SIGMA = 1.5
C1 = 0.01 ** 2
C2 = 0.03 ** 2


def _gaussian_1d(size=WIN, sigma=SIGMA):
    x = jnp.arange(size, dtype=jnp.float32) - (size // 2)
    g = jnp.exp(-(x ** 2) / (2.0 * sigma ** 2))
    return g / jnp.sum(g)


def _filter_matrix(n, g):
    # F[i, j] = g[j - i + pad]  (zero-padded 'same' cross-correlation along an axis)
    pad = g.shape[0] // 2
    i = jnp.arange(n)[:, None]
    j = jnp.arange(n)[None, :]
    k = j - i + pad
    valid = (k >= 0) & (k < g.shape[0])
    return jnp.where(valid, g[jnp.clip(k, 0, g.shape[0] - 1)], 0.0).astype(jnp.float32)


def _default_vmem_limit():
    """Generation-aware VMEM limit (~40 MiB on v7x, ~83 MiB on v5e/v6e)."""
    try:
        cap = pltpu.get_tpu_info().vmem_capacity_bytes
    except Exception:
        cap = 64 << 20  # conservative fallback (v7x per-TC capacity)
    return int(min(int(0.65 * cap), 96 << 20))


def _pick_block_b(B, H, W, vmem_limit):
    # Live-VMEM model per batch row, in f32-image units of H*W*4 bytes:
    #   double-buffered inputs (<=4) + bf16 operand-stack scratch (2.5)
    #   + bf16 W-pass result and its transpose (5) + f32 mu scratch (5)
    #   + f32 dot-result / algebra temporaries (~8)  ->  ~25; use 28 for margin.
    per_row = 28 * H * W * 4
    fixed = 4 * (H * H + W * W) + 2 * 8 * 128 * 4 + (1 << 20)  # filters(x2 buf), out, slack
    budget = max(vmem_limit - fixed, per_row)
    bb = max(1, min(B, budget // per_row))
    # Keep >= 2 grid steps so the "parallel" batch axis can be sharded across the
    # two v7x TensorCores (costs one ~0.35us grid step on single-TC chips).
    bb = min(bb, max(1, (B + 1) // 2))
    return int(bb)


def combined_loss(a, b, *, alpha=ALPHA, block_b=None, vmem_limit_bytes=None):
    """a, b: (N, C, H, W) arrays (PyTorch NCHW). Returns the scalar CombinedLoss."""
    N, C, H, W = a.shape
    assert H % 8 == 0 and W % 8 == 0, "H and W must be multiples of 8 (see TODO)"
    B = N * C
    a2 = a.reshape(B, H, W)  # keep the incoming dtype; no up-cast in the wrapper
    b2 = b.reshape(B, H, W)

    if vmem_limit_bytes is None:
        vmem_limit_bytes = _default_vmem_limit()

    bb = block_b if block_b is not None else _pick_block_b(B, H, W, vmem_limit_bytes)
    nb = (B + bb - 1) // bb
    b_pad = nb * bb
    need_mask = b_pad != B
    if need_mask:
        pad = b_pad - B
        a2 = jnp.concatenate([a2, jnp.zeros((pad, H, W), a2.dtype)], axis=0)
        b2 = jnp.concatenate([b2, jnp.zeros((pad, H, W), b2.dtype)], axis=0)

    g = _gaussian_1d()
    fwt = _filter_matrix(W, g).T.astype(jnp.bfloat16)  # W-pass Toeplitz, pre-transposed
    fht = _filter_matrix(H, g).T.astype(jnp.bfloat16)  # H-pass Toeplitz, pre-transposed

    def kernel(a_ref, b_ref, fwt_ref, fht_ref, out_ref, x_scr, z_scr):
        a32 = a_ref[...].astype(jnp.float32)  # (bb, H, W)
        b32 = b_ref[...].astype(jnp.float32)

        # ---- Huber partial sum (delta = 1.0), f32.  Zero-padded batch rows give
        # ---- a - b == 0 exactly, so no mask is needed here.
        d = a32 - b32
        ad = jnp.abs(d)
        huber_sum = jnp.sum(jnp.where(ad < 1.0, 0.5 * d * d, ad - 0.5))

        # ---- Five filter operands, written slab-by-slab into a bf16 VMEM scratch
        # ---- (no concatenate copies); products computed natively in bf16.
        a16 = a32.astype(jnp.bfloat16)
        b16 = b32.astype(jnp.bfloat16)
        x_scr[0] = a16
        x_scr[1] = b16
        x_scr[2] = a16 * a16
        x_scr[3] = b16 * b16
        x_scr[4] = a16 * b16

        # ---- W-pass: one big 2D matmul, M = 5*bb*H, bf16 result (no f32 copy).
        yw = jnp.dot(x_scr[...].reshape(5 * bb * H, W), fwt_ref[...],
                     preferred_element_type=jnp.float32).astype(jnp.bfloat16)
        # One XLU transpose of the bf16 intermediate; everything below stays (.., W, H).
        yt = jnp.transpose(yw.reshape(5 * bb, H, W), (0, 2, 1)).reshape(5 * bb * W, H)
        # ---- H-pass: second big 2D matmul, M = 5*bb*W, f32 accumulation, into scratch.
        z_scr[...] = jnp.dot(yt, fht_ref[...],
                             preferred_element_type=jnp.float32).reshape(5, bb, W, H)

        # ---- SSIM algebra in f32; mu maps via static ref indexing (free views).
        mu_a = z_scr[0]
        mu_b = z_scr[1]
        mu_aa = z_scr[2]
        mu_bb = z_scr[3]
        mu_ab = z_scr[4]

        mu_a2 = mu_a * mu_a
        mu_b2 = mu_b * mu_b
        mu_ab_p = mu_a * mu_b
        sig_a = mu_aa - mu_a2
        sig_b = mu_bb - mu_b2
        sig_ab = mu_ab - mu_ab_p
        num = (2.0 * mu_ab_p + C1) * (2.0 * sig_ab + C2)
        den = (mu_a2 + mu_b2 + C1) * (sig_a + sig_b + C2)
        ssim_map = num * pl.reciprocal(den, approx=True)

        if need_mask:  # only traced when the last block contains padded rows
            gidx = pl.program_id(0) * bb + jax.lax.broadcasted_iota(
                jnp.int32, ssim_map.shape, 0)
            ssim_map = jnp.where(gidx < B, ssim_map, 0.0)
        ssim_sum = jnp.sum(ssim_map)

        # Lane-dense partial-sum block: row 0 -> huber_sum, row 1 -> ssim_sum
        # (wrapper only reads [*, 0, 0] and [*, 1, 0]).  Single iota + single select.
        row = jax.lax.broadcasted_iota(jnp.int32, (8, 128), 0)
        out_ref[0] = jnp.where(row == 0, huber_sum, ssim_sum)

    flops = 10 * b_pad * H * W * (H + W) + 40 * b_pad * H * W
    bytes_accessed = (a2.size * a2.dtype.itemsize + b2.size * b2.dtype.itemsize
                      + fwt.size * 2 + fht.size * 2 + nb * 8 * 128 * 4)

    parts = pl.pallas_call(
        kernel,
        out_shape=jax.ShapeDtypeStruct((nb, 8, 128), jnp.float32),
        grid_spec=pltpu.PrefetchScalarGridSpec(
            num_scalar_prefetch=0,
            grid=(nb,),
            in_specs=[
                pl.BlockSpec((bb, H, W), lambda i: (i, 0, 0)),
                pl.BlockSpec((bb, H, W), lambda i: (i, 0, 0)),
                pl.BlockSpec((W, W), lambda i: (0, 0)),   # filters resident across grid
                pl.BlockSpec((H, H), lambda i: (0, 0)),
            ],
            out_specs=pl.BlockSpec((1, 8, 128), lambda i: (i, 0, 0)),
            scratch_shapes=[
                pltpu.VMEM((5, bb, H, W), jnp.bfloat16),   # operand stack
                pltpu.VMEM((5, bb, W, H), jnp.float32),    # filtered mu maps
            ],
        ),
        compiler_params=pltpu.CompilerParams(
            dimension_semantics=("parallel",),
            vmem_limit_bytes=int(vmem_limit_bytes),
        ),
        cost_estimate=pl.CostEstimate(
            flops=int(flops),
            transcendentals=int(b_pad * H * W),
            bytes_accessed=int(bytes_accessed),
        ),
    )(a2, b2, fwt, fht)

    n_elems = B * H * W
    huber = jnp.sum(parts[:, 0, 0]) / n_elems
    ssim_mean = jnp.sum(parts[:, 1, 0]) / n_elems
    ssim_loss = 1.0 - ssim_mean
    return alpha * huber + (1.0 - alpha) * ssim_loss


def _reference_loss(a, b, alpha=ALPHA):
    """Pure-JAX f32 reference with the same SSIM definition (sanity check)."""
    N, C, H, W = a.shape
    a2 = a.reshape(N * C, H, W).astype(jnp.float32)
    b2 = b.reshape(N * C, H, W).astype(jnp.float32)
    g = _gaussian_1d()
    fh = _filter_matrix(H, g)
    fw = _filter_matrix(W, g)

    def filt(x):
        y = jnp.einsum('ih,bhw->biw', fh, x)
        return jnp.einsum('biw,kw->bik', y, fw)

    d = a2 - b2
    ad = jnp.abs(d)
    huber = jnp.mean(jnp.where(ad < 1.0, 0.5 * d * d, ad - 0.5))
    mu_a, mu_b = filt(a2), filt(b2)
    mu_aa, mu_bb, mu_ab = filt(a2 * a2), filt(b2 * b2), filt(a2 * b2)
    sigma_a = mu_aa - mu_a * mu_a
    sigma_b = mu_bb - mu_b * mu_b
    sigma_ab = mu_ab - mu_a * mu_b
    num = (2.0 * mu_a * mu_b + C1) * (2.0 * sigma_ab + C2)
    den = (mu_a * mu_a + mu_b * mu_b + C1) * (sigma_a + sigma_b + C2)
    ssim_loss = 1.0 - jnp.mean(num / den)
    return alpha * huber + (1.0 - alpha) * ssim_loss


if __name__ == "__main__":
    key = jax.random.PRNGKey(0)
    ka, kb = jax.random.split(key)
    N, C, H, W = 2, 4, 16, 16
    # images in [0, 1] (SSIM data_range=1 assumption)
    a = jax.random.uniform(ka, (N, C, H, W), dtype=jnp.float32)
    b = jnp.clip(a + 0.05 * jax.random.normal(kb, (N, C, H, W), dtype=jnp.float32),
                 0.0, 1.0)

    ref = _reference_loss(a, b)

    # Default block picking: B=8 -> bb=4, nb=2 (exercises the parallel partial-sum path).
    loss = combined_loss(a, b)
    jax.block_until_ready(loss)
    assert jnp.isfinite(loss)
    # loose tolerance: kernel uses bf16 MXU operands + approx reciprocal
    assert abs(float(loss) - float(ref)) < 5e-2, (float(loss), float(ref))

    # block_b=3 -> nb=3, padded last block (exercises the ragged-batch mask path).
    loss_ragged = combined_loss(a, b, block_b=3)
    jax.block_until_ready(loss_ragged)
    assert jnp.isfinite(loss_ragged)
    assert abs(float(loss_ragged) - float(ref)) < 5e-2, (float(loss_ragged), float(ref))

    print("KERNEL_OK")
</pallas_src>

<mosaic_0001>
module attributes {stable_mosaic.version = 11 : i64} {
  func.func @kernel(%arg0: i32, %arg1: memref<4x16x16xf32, #tpu.memory_space<vmem>>, %arg2: memref<4x16x16xf32, #tpu.memory_space<vmem>>, %arg3: memref<16x16xbf16, #tpu.memory_space<vmem>>, %arg4: memref<16x16xbf16, #tpu.memory_space<vmem>>, %arg5: memref<1x8x128xf32, #tpu.memory_space<vmem>>, %arg6: memref<5x4x16x16xbf16, #tpu.memory_space<vmem>>, %arg7: memref<5x4x16x16xf32, #tpu.memory_space<vmem>>) attributes {dimension_semantics = [#tpu.dimension_semantics<parallel>], iteration_bounds = array<i64: 2>, scalar_prefetch = 0 : i64, scratch_operands = 2 : i64, tpu.core_type = #tpu.core_type<tc>, window_params = [{transform_indices = @transform_0, window_bounds = array<i64: 4, 16, 16>}, {transform_indices = @transform_1, window_bounds = array<i64: 4, 16, 16>}, {pipeline_mode = #tpu.pipeline_mode<synchronous>, transform_indices = @transform_2, window_bounds = array<i64: 16, 16>}, {pipeline_mode = #tpu.pipeline_mode<synchronous>, transform_indices = @transform_3, window_bounds = array<i64: 16, 16>}, {transform_indices = @transform_4, window_bounds = array<i64: 1, 8, 128>}]} {
    %c0 = arith.constant 0 : index
    %c0_0 = arith.constant 0 : index
    %c0_1 = arith.constant 0 : index
    %0 = vector.load %arg1[%c0, %c0_0, %c0_1] : memref<4x16x16xf32, #tpu.memory_space<vmem>>, vector<4x16x16xf32>
    %c0_2 = arith.constant 0 : index
    %c0_3 = arith.constant 0 : index
    %c0_4 = arith.constant 0 : index
    %1 = vector.load %arg2[%c0_2, %c0_3, %c0_4] : memref<4x16x16xf32, #tpu.memory_space<vmem>>, vector<4x16x16xf32>
    %2 = arith.subf %0, %1 : vector<4x16x16xf32>
    %3 = math.absf %2 : vector<4x16x16xf32>
    %cst = arith.constant 1.000000e+00 : f32
    %4 = vector.broadcast %cst : f32 to vector<4x16x16xf32>
    %5 = arith.cmpf olt, %3, %4 : vector<4x16x16xf32>
    %cst_5 = arith.constant 5.000000e-01 : f32
    %6 = vector.broadcast %cst_5 : f32 to vector<4x16x16xf32>
    %7 = arith.mulf %6, %2 : vector<4x16x16xf32>
    %8 = arith.mulf %7, %2 : vector<4x16x16xf32>
    %cst_6 = arith.constant 5.000000e-01 : f32
    %9 = vector.broadcast %cst_6 : f32 to vector<4x16x16xf32>
    %10 = arith.subf %3, %9 : vector<4x16x16xf32>
    %11 = arith.select %5, %8, %10 : vector<4x16x16xi1>, vector<4x16x16xf32>
    %12 = vector.shape_cast %11 : vector<4x16x16xf32> to vector<1x4x16x16xf32>
    %cst_7 = arith.constant dense<0.000000e+00> : vector<1xf32>
    %13 = vector.multi_reduction <add>, %12, %cst_7 [1, 2, 3] : vector<1x4x16x16xf32> to vector<1xf32>
    %14 = vector.shape_cast %13 : vector<1xf32> to vector<1x1x1x1xf32>
    %15 = vector.extract %14[0, 0, 0, 0] : f32 from vector<1x1x1x1xf32>
    %16 = arith.truncf %0 : vector<4x16x16xf32> to vector<4x16x16xbf16>
    %17 = arith.truncf %1 : vector<4x16x16xf32> to vector<4x16x16xbf16>
    %c0_8 = arith.constant 0 : index
    %c0_9 = arith.constant 0 : index
    %c0_10 = arith.constant 0 : index
    %c0_11 = arith.constant 0 : index
    %18 = vector.load %arg6[%c0_8, %c0_9, %c0_10, %c0_11] : memref<5x4x16x16xbf16, #tpu.memory_space<vmem>>, vector<1x4x16x16xbf16>
    %19 = vector.shape_cast %18 : vector<1x4x16x16xbf16> to vector<4x16x16xbf16>
    %20 = vector.shape_cast %16 : vector<4x16x16xbf16> to vector<1x4x16x16xbf16>
    tpu.vector_store %arg6[%c0_8, %c0_9, %c0_10, %c0_11], %20 {strides = array<i32>} : memref<5x4x16x16xbf16, #tpu.memory_space<vmem>>, vector<1x4x16x16xbf16>,
    %c1 = arith.constant 1 : index
    %c0_12 = arith.constant 0 : index
    %c0_13 = arith.constant 0 : index
    %c0_14 = arith.constant 0 : index
    %21 = vector.load %arg6[%c1, %c0_12, %c0_13, %c0_14] : memref<5x4x16x16xbf16, #tpu.memory_space<vmem>>, vector<1x4x16x16xbf16>
    %22 = vector.shape_cast %21 : vector<1x4x16x16xbf16> to vector<4x16x16xbf16>
    %23 = vector.shape_cast %17 : vector<4x16x16xbf16> to vector<1x4x16x16xbf16>
    tpu.vector_store %arg6[%c1, %c0_12, %c0_13, %c0_14], %23 {strides = array<i32>} : memref<5x4x16x16xbf16, #tpu.memory_space<vmem>>, vector<1x4x16x16xbf16>,
    %24 = arith.mulf %16, %16 : vector<4x16x16xbf16>
    %c2 = arith.constant 2 : index
    %c0_15 = arith.constant 0 : index
    %c0_16 = arith.constant 0 : index
    %c0_17 = arith.constant 0 : index
    %25 = vector.load %arg6[%c2, %c0_15, %c0_16, %c0_17] : memref<5x4x16x16xbf16, #tpu.memory_space<vmem>>, vector<1x4x16x16xbf16>
    %26 = vector.shape_cast %25 : vector<1x4x16x16xbf16> to vector<4x16x16xbf16>
    %27 = vector.shape_cast %24 : vector<4x16x16xbf16> to vector<1x4x16x16xbf16>
    tpu.vector_store %arg6[%c2, %c0_15, %c0_16, %c0_17], %27 {strides = array<i32>} : memref<5x4x16x16xbf16, #tpu.memory_space<vmem>>, vector<1x4x16x16xbf16>,
    %28 = arith.mulf %17, %17 : vector<4x16x16xbf16>
    %c3 = arith.constant 3 : index
    %c0_18 = arith.constant 0 : index
    %c0_19 = arith.constant 0 : index
    %c0_20 = arith.constant 0 : index
    %29 = vector.load %arg6[%c3, %c0_18, %c0_19, %c0_20] : memref<5x4x16x16xbf16, #tpu.memory_space<vmem>>, vector<1x4x16x16xbf16>
    %30 = vector.shape_cast %29 : vector<1x4x16x16xbf16> to vector<4x16x16xbf16>
    %31 = vector.shape_cast %28 : vector<4x16x16xbf16> to vector<1x4x16x16xbf16>
    tpu.vector_store %arg6[%c3, %c0_18, %c0_19, %c0_20], %31 {strides = array<i32>} : memref<5x4x16x16xbf16, #tpu.memory_space<vmem>>, vector<1x4x16x16xbf16>,
    %32 = arith.mulf %16, %17 : vector<4x16x16xbf16>
    %c4 = arith.constant 4 : index
    %c0_21 = arith.constant 0 : index
    %c0_22 = arith.constant 0 : index
    %c0_23 = arith.constant 0 : index
    %33 = vector.load %arg6[%c4, %c0_21, %c0_22, %c0_23] : memref<5x4x16x16xbf16, #tpu.memory_space<vmem>>, vector<1x4x16x16xbf16>
    %34 = vector.shape_cast %33 : vector<1x4x16x16xbf16> to vector<4x16x16xbf16>
    %35 = vector.shape_cast %32 : vector<4x16x16xbf16> to vector<1x4x16x16xbf16>
    tpu.vector_store %arg6[%c4, %c0_21, %c0_22, %c0_23], %35 {strides = array<i32>} : memref<5x4x16x16xbf16, #tpu.memory_space<vmem>>, vector<1x4x16x16xbf16>,
    %c0_24 = arith.constant 0 : index
    %c0_25 = arith.constant 0 : index
    %c0_26 = arith.constant 0 : index
    %c0_27 = arith.constant 0 : index
    %36 = vector.load %arg6[%c0_24, %c0_25, %c0_26, %c0_27] : memref<5x4x16x16xbf16, #tpu.memory_space<vmem>>, vector<5x4x16x16xbf16>
    %37 = vector.shape_cast %36 : vector<5x4x16x16xbf16> to vector<320x16xbf16>
    %c0_28 = arith.constant 0 : index
    %c0_29 = arith.constant 0 : index
    %38 = vector.load %arg3[%c0_28, %c0_29] : memref<16x16xbf16, #tpu.memory_space<vmem>>, vector<16x16xbf16>
    %cst_30 = arith.constant dense<0.000000e+00> : vector<320x16xf32>
    %39 = tpu.matmul %37, %38, %cst_30 {dimension_numbers = #tpu.dot_dimension_numbers<[1], [0], [0], [1], [0, 0, 1, 1], [], []>} : vector<320x16xbf16>, vector<16x16xbf16>, vector<320x16xf32> -> vector<320x16xf32>
    %40 = arith.truncf %39 : vector<320x16xf32> to vector<320x16xbf16>
    %41 = vector.shape_cast %40 : vector<320x16xbf16> to vector<20x16x16xbf16>
    %42 = tpu.transpose %41, [0, 2, 1] : vector<20x16x16xbf16> -> vector<20x16x16xbf16>
    %43 = vector.shape_cast %42 : vector<20x16x16xbf16> to vector<320x16xbf16>
    %c0_31 = arith.constant 0 : index
    %c0_32 = arith.constant 0 : index
    %44 = vector.load %arg4[%c0_31, %c0_32] : memref<16x16xbf16, #tpu.memory_space<vmem>>, vector<16x16xbf16>
    %cst_33 = arith.constant dense<0.000000e+00> : vector<320x16xf32>
    %45 = tpu.matmul %43, %44, %cst_33 {dimension_numbers = #tpu.dot_dimension_numbers<[1], [0], [0], [1], [0, 0, 1, 1], [], []>} : vector<320x16xbf16>, vector<16x16xbf16>, vector<320x16xf32> -> vector<320x16xf32>
    %46 = vector.shape_cast %45 : vector<320x16xf32> to vector<5x4x16x16xf32>
    %c0_34 = arith.constant 0 : index
    %c0_35 = arith.constant 0 : index
    %c0_36 = arith.constant 0 : index
    %c0_37 = arith.constant 0 : index
    %47 = vector.load %arg7[%c0_34, %c0_35, %c0_36, %c0_37] : memref<5x4x16x16xf32, #tpu.memory_space<vmem>>, vector<5x4x16x16xf32>
    tpu.vector_store %arg7[%c0_34, %c0_35, %c0_36, %c0_37], %46 {strides = array<i32>} : memref<5x4x16x16xf32, #tpu.memory_space<vmem>>, vector<5x4x16x16xf32>,
    %c0_38 = arith.constant 0 : index
    %c0_39 = arith.constant 0 : index
    %c0_40 = arith.constant 0 : index
    %c0_41 = arith.constant 0 : index
    %48 = vector.load %arg7[%c0_38, %c0_39, %c0_40, %c0_41] : memref<5x4x16x16xf32, #tpu.memory_space<vmem>>, vector<1x4x16x16xf32>
    %49 = vector.shape_cast %48 : vector<1x4x16x16xf32> to vector<4x16x16xf32>
    %c1_42 = arith.constant 1 : index
    %c0_43 = arith.constant 0 : index
    %c0_44 = arith.constant 0 : index
    %c0_45 = arith.constant 0 : index
    %50 = vector.load %arg7[%c1_42, %c0_43, %c0_44, %c0_45] : memref<5x4x16x16xf32, #tpu.memory_space<vmem>>, vector<1x4x16x16xf32>
    %51 = vector.shape_cast %50 : vector<1x4x16x16xf32> to vector<4x16x16xf32>
    %c2_46 = arith.constant 2 : index
    %c0_47 = arith.constant 0 : index
    %c0_48 = arith.constant 0 : index
    %c0_49 = arith.constant 0 : index
    %52 = vector.load %arg7[%c2_46, %c0_47, %c0_48, %c0_49] : memref<5x4x16x16xf32, #tpu.memory_space<vmem>>, vector<1x4x16x16xf32>
    %53 = vector.shape_cast %52 : vector<1x4x16x16xf32> to vector<4x16x16xf32>
    %c3_50 = arith.constant 3 : index
    %c0_51 = arith.constant 0 : index
    %c0_52 = arith.constant 0 : index
    %c0_53 = arith.constant 0 : index
    %54 = vector.load %arg7[%c3_50, %c0_51, %c0_52, %c0_53] : memref<5x4x16x16xf32, #tpu.memory_space<vmem>>, vector<1x4x16x16xf32>
    %55 = vector.shape_cast %54 : vector<1x4x16x16xf32> to vector<4x16x16xf32>
    %c4_54 = arith.constant 4 : index
    %c0_55 = arith.constant 0 : index
    %c0_56 = arith.constant 0 : index
    %c0_57 = arith.constant 0 : index
    %56 = vector.load %arg7[%c4_54, %c0_55, %c0_56, %c0_57] : memref<5x4x16x16xf32, #tpu.memory_space<vmem>>, vector<1x4x16x16xf32>
    %57 = vector.shape_cast %56 : vector<1x4x16x16xf32> to vector<4x16x16xf32>
    %58 = arith.mulf %49, %49 : vector<4x16x16xf32>
    %59 = arith.mulf %51, %51 : vector<4x16x16xf32>
    %60 = arith.mulf %49, %51 : vector<4x16x16xf32>
    %61 = arith.subf %53, %58 : vector<4x16x16xf32>
    %62 = arith.subf %55, %59 : vector<4x16x16xf32>
    %63 = arith.subf %57, %60 : vector<4x16x16xf32>
    %cst_58 = arith.constant 2.000000e+00 : f32
    %64 = vector.broadcast %cst_58 : f32 to vector<4x16x16xf32>
    %65 = arith.mulf %64, %60 : vector<4x16x16xf32>
    %cst_59 = arith.constant 9.99999974E-5 : f32
    %66 = vector.broadcast %cst_59 : f32 to vector<4x16x16xf32>
    %67 = arith.addf %65, %66 : vector<4x16x16xf32>
    %cst_60 = arith.constant 2.000000e+00 : f32
    %68 = vector.broadcast %cst_60 : f32 to vector<4x16x16xf32>
    %69 = arith.mulf %68, %63 : vector<4x16x16xf32>
    %cst_61 = arith.constant 8.99999984E-4 : f32
    %70 = vector.broadcast %cst_61 : f32 to vector<4x16x16xf32>
    %71 = arith.addf %69, %70 : vector<4x16x16xf32>
    %72 = arith.mulf %67, %71 : vector<4x16x16xf32>
    %73 = arith.addf %58, %59 : vector<4x16x16xf32>
    %cst_62 = arith.constant 9.99999974E-5 : f32
    %74 = vector.broadcast %cst_62 : f32 to vector<4x16x16xf32>
    %75 = arith.addf %73, %74 : vector<4x16x16xf32>
    %76 = arith.addf %61, %62 : vector<4x16x16xf32>
    %cst_63 = arith.constant 8.99999984E-4 : f32
    %77 = vector.broadcast %cst_63 : f32 to vector<4x16x16xf32>
    %78 = arith.addf %76, %77 : vector<4x16x16xf32>
    %79 = arith.mulf %75, %78 : vector<4x16x16xf32>
    %80 = tpu.reciprocal %79 {approx = true} : vector<4x16x16xf32> -> vector<4x16x16xf32>
    %81 = arith.mulf %72, %80 : vector<4x16x16xf32>
    %82 = vector.shape_cast %81 : vector<4x16x16xf32> to vector<1x4x16x16xf32>
    %cst_64 = arith.constant dense<0.000000e+00> : vector<1xf32>
    %83 = vector.multi_reduction <add>, %82, %cst_64 [1, 2, 3] : vector<1x4x16x16xf32> to vector<1xf32>
    %84 = vector.shape_cast %83 : vector<1xf32> to vector<1x1x1x1xf32>
    %85 = vector.extract %84[0, 0, 0, 0] : f32 from vector<1x1x1x1xf32>
    %86 = tpu.iota {dimensions = array<i32: 0>} : vector<8x128xi32>
    %c0_i32 = arith.constant 0 : i32
    %87 = vector.broadcast %c0_i32 : i32 to vector<8x128xi32>
    %88 = arith.cmpi eq, %86, %87 : vector<8x128xi32>
    %89 = vector.broadcast %15 : f32 to vector<8x128xf32>
    %90 = vector.broadcast %85 : f32 to vector<8x128xf32>
    %91 = arith.select %88, %89, %90 : vector<8x128xi1>, vector<8x128xf32>
    %c0_65 = arith.constant 0 : index
    %c0_66 = arith.constant 0 : index
    %c0_67 = arith.constant 0 : index
    %92 = vector.load %arg5[%c0_65, %c0_66, %c0_67] : memref<1x8x128xf32, #tpu.memory_space<vmem>>, vector<1x8x128xf32>
    %93 = vector.shape_cast %92 : vector<1x8x128xf32> to vector<8x128xf32>
    %94 = vector.shape_cast %91 : vector<8x128xf32> to vector<1x8x128xf32>
    tpu.vector_store %arg5[%c0_65, %c0_66, %c0_67], %94 {strides = array<i32>} : memref<1x8x128xf32, #tpu.memory_space<vmem>>, vector<1x8x128xf32>,
    return
  }
  func.func @transform_0(%arg0: i32) -> (i32, i32, i32) {
    %c0_i32 = arith.constant 0 : i32
    %c0_i32_0 = arith.constant 0 : i32
    %c0_i32_1 = arith.constant 0 : i32
    return %arg0, %c0_i32, %c0_i32_0 : i32, i32, i32
  }
  func.func @transform_1(%arg0: i32) -> (i32, i32, i32) {
    %c0_i32 = arith.constant 0 : i32
    %c0_i32_0 = arith.constant 0 : i32
    %c0_i32_1 = arith.constant 0 : i32
    return %arg0, %c0_i32, %c0_i32_0 : i32, i32, i32
  }
  func.func @transform_2(%arg0: i32) -> (i32, i32) {
    %c0_i32 = arith.constant 0 : i32
    %c0_i32_0 = arith.constant 0 : i32
    %c0_i32_1 = arith.constant 0 : i32
    return %c0_i32, %c0_i32_0 : i32, i32
  }
  func.func @transform_3(%arg0: i32) -> (i32, i32) {
    %c0_i32 = arith.constant 0 : i32
    %c0_i32_0 = arith.constant 0 : i32
    %c0_i32_1 = arith.constant 0 : i32
    return %c0_i32, %c0_i32_0 : i32, i32
  }
  func.func @transform_4(%arg0: i32) -> (i32, i32, i32) {
    %c0_i32 = arith.constant 0 : i32
    %c0_i32_0 = arith.constant 0 : i32
    %c0_i32_1 = arith.constant 0 : i32
    return %arg0, %c0_i32, %c0_i32_0 : i32, i32, i32
  }
}

</mosaic_0001>

<bundles_post_ra>
// kernel: tpu_custom_call.1
= control target key start
LH: loop header
LB: loop body
LE: loop exit
PB: predicated region body
PF: predicated region fallthrough
CT: control target
= control target key end

     0   :  { %s2726_s0 = inlined_call_operand.hbm [shape: f32[8,16,16], index: 0, kind: input, shape index: {}]   ;;  %s2727_s1 = inlined_call_operand.hbm [shape: f32[8,16,16], index: 1, kind: input, shape index: {}]   ;;  %s2728_s2 = inlined_call_operand.hbm [shape: bf16[16,16], index: 2, kind: input, shape index: {}]   ;;  %s2729_s3 = inlined_call_operand.vmem [shape: bf16[16,16], index: 3, kind: input, shape index: {}]   ;;  %s2730_s4 = inlined_call_operand.hbm [shape: f32[2,8,128], index: 4, kind: output, shape index: {}]  }
   0x1   :  { %2734 = sst [smem:[#allocation15_spill]] %s2726_s0 }
   0x2   :  { %9 = vsyncpa [#allocation5], 0 }
   0x3   :  { %11 = vsyncpa [#allocation5 + $0x1], 0 }
   0x4   :  { %12 = vsyncpa [#allocation8], 0 }
   0x5   :  { %14 = vsyncpa [#allocation8 + $0x1], 0 }
   0x6   :  { %15 = vsyncpa [#allocation6], 0 }
   0x7   :  { %17 = vsyncpa [#allocation6 + $0x1], 0  ;;  %s2160_s15 = smov 0   ;;  %s2162_s16 = smov 0  }
   0x8   :  { %s2164_s17 = smov 0   ;;  %s2166_s18 = smov 0  }
   0x9 LB: > { %s2181_s19 = sadd.s32 4294967295, %s2125_s18   ;;  %s1673_s20 = sadd.s32 4294967294, %s2125_s18   ;;  %s2125_s18 = sphi %s2166_s18, %s2764_s18   ;;  %s2121_s17 = sphi %s2164_s17, %s2763_s17   ;;  %s2117_s16 = sphi %s2162_s16, %s2762_s16   ;;  %s2113_s15 = sphi %s2160_s15, %s2761_s15  }
   0xa   : > { %p43_p0 = scmp.ne.s32.totalorder %s2117_s16, %s2113_s15  ;;  %p2731_p1 = scmp.eq.s32.totalorder %s2181_s19, 0 }
   0xb   : > { %p141_p3 = scmp.eq.s32.totalorder %s1673_s20, 1  ;;  %p1674_p5 = scmp.ge.s32.totalorder %s2125_s18, 1 }
   0xc   : > { %p2190_p4 = por %p2731_p1, %p43_p0  ;;  %p148_p7 = scmp.lt.s32.totalorder %s2125_s18, 3 }
   0xd   : > { %p2195_p6 = por %p141_p3, %p43_p0  ;;  %s2127_s24 = smov [#allocation9]  }
   0xe   : > { %s2735_s21 = scalar_select %p2190_p4, 1, 0 }
   0xf   : > { %s2736_s22 = scalar_select %p2195_p6, 1, 0 }
  0x10   : > { %p2200_p8 = pnand %p1674_p5, %p148_p7  ;;  %s160_s25 = sshll.u32 %s2127_s24, 4  ;;  %s2204_s25 = int_to_ptr.vmem [resolvable:$true] %s160_s25 }
  0x11   : > { %s2216_s27 = sadd.s32 1, %s2125_s18   ;;  %s30_s28 = sadd.s32 1, %s2121_s17 }
  0x12   : > { %s2737_s23 = scalar_select %p2200_p8, 1, 0 }
  0x13   : > { %p1888_p9 = pneg %p2200_p8  ;;  %s27_s29 = ssub.s32 %s2125_s18, %s2216_s27 }
  0x14   : > { %s1963_s6 = scalar_lea.hbm %s2728_s2, 128 }
  0x15   : > { %p2211_p11 = pnand %p1888_p9, %p2731_p1  ;;  %p1964_p12 = scmp.ne.s32.totalorder %s2728_s2, %s1963_s6 }
  0x16   : > { %p1970_p5 = scmp.lt.u32.totalorder %s1963_s6, %s2728_s2 }
  0x17   : > { %p1965_p13 = pneg %p2211_p11 }
  0x19   : > { %p1966_p0 = pnand %p1965_p13, %p1964_p12 }
  0x1b   : > { %p1967_p3 = pneg %p1966_p0 }
  0x1d   : > { %p1972_p7 = pnand %p1970_p5, %p1967_p3 }
  0x1f   : > { %1975 = shalt.err (!%p1972_p7)
}
  0x20   : > { %s1976_s11 = scalar_lea.vmem %s2204_s25, 128  ;;  %p1984_p2 = scmp.lt.s32.totalorder %s2204_s25, %s2204_s25 }
  0x21   : > { %p1977_p9 = scmp.ne.s32.totalorder %s2204_s25, %s1976_s11  ;;  %p1985_p6 = scmp.lt.s32.totalorder %s1976_s11, %s1976_s11 }
  0x23   : > { %p1979_p10 = pnand %p1977_p9, %p1965_p13  ;;  %p1986_p4 = por %p1985_p6, %p1984_p2 }
  0x25   : > { %p1980_p1 = pneg %p1979_p10 }
  0x27   : > { %p1987_p8 = pnand %p1986_p4, %p1980_p1 }
  0x29   : > { %1990 = shalt.err (!%p1987_p8)
}
  0x2a   : > { %s2128_s12 = smov 64   ;;  %s2129_s13 = smov 4  }
  0x2b   : > { %1891 = dma.hbm_to_vmem [thread:$0]  (!%p2211_p11), %s2728_s2, 128, %s2204_s25, [#allocation8], %s2128_s12, %s2128_s12, %s2129_s13  }
  0x2c   : > { %p28_p1 = scmp.eq.s32.totalorder %s27_s29, 0  ;;  %p37_p2 = scmp.ne.s32.totalorder %s2121_s17, %s2117_s16 }
  0x2d   : > { %p38_p4 = scmp.eq.s32.totalorder %s2125_s18, 0  ;;  %p1904_p6 = scmp.lt.s32.totalorder %s2125_s18, 2 }
  0x2e   : > { %s2247_s24 = scalar_select %p28_p1, %s2121_s17, %s30_s28  }
  0x2f   : > { %p39_p8 = por %p38_p4, %p37_p2  ;;  %p2739_p10 = scmp.eq.s32.totalorder %s2181_s19, 1 }
  0x30   : > { %s177_s5 = sand.u32 1, %s2121_s17   ;;  %s1745_s6 = sshll.u32 %s2125_s18, 10 }
  0x31   : > { %p2251_p12 = por %p2739_p10, %p37_p2  ;;  %s2257_s7 = sshll.u32 %s177_s5, 6 }
  0x32   : > { %s2741_s0 = sld [smem:[#allocation15_spill]]  ;;  %s181_s28 = scalar_lea.vmem [#allocation4], %s2257_s7 }
  0x33   : > { %s189_s29 = sshll.u32 %s181_s28, 4  ;;  %p2267_p11 = pnand %p1904_p6, %p39_p8  ;;  %s2271_s29 = int_to_ptr.vmem [resolvable:$true] %s189_s29 }
  0x34   : > { %s2273_s10 = scalar_lea.sflag [#allocation5], %s177_s5 }
  0x35   : > { %p1993_p0 = pneg %p2267_p11 }
  0x38   : > { %s2264_s25 = scalar_lea.hbm %s2741_s0, %s1745_s6  ;;  %s1996_s14 = scalar_lea.hbm %s2741_s0, 2048 }
  0x39   : > { %s1991_s11 = scalar_lea.hbm %s2264_s25, 1024  ;;  %p1997_p7 = scmp.lt.u32.totalorder %s2264_s25, %s2741_s0 }
  0x3a   : > { %p1992_p13 = scmp.ne.s32.totalorder %s2264_s25, %s1991_s11  ;;  %p1998_p9 = scmp.lt.u32.totalorder %s1996_s14, %s1991_s11 }
  0x3b   : > { %p2000_p2 = scmp.lt.u32.totalorder %s1991_s11, %s2264_s25 }
  0x3c   : > { %p1994_p3 = pnand %p1993_p0, %p1992_p13  ;;  %p1999_p1 = por %p1998_p9, %p1997_p7 }
  0x3e   : > { %p1995_p5 = pneg %p1994_p3  ;;  %p2001_p4 = por %p2000_p2, %p1999_p1 }
  0x40   : > { %p2002_p6 = pnand %p2001_p4, %p1995_p5 }
  0x42   : > { %2005 = shalt.err (!%p2002_p6)
}
  0x43   : > { %s2006_s5 = scalar_lea.vmem %s2271_s29, 1024  ;;  %s2130_s8 = smov [#allocation4]  }
  0x44   : > { %p2007_p8 = scmp.ne.s32.totalorder %s2271_s29, %s2006_s5  ;;  %s2011_s28 = sshll.u32 %s2130_s8, 4  ;;  %s2012_s28 = int_to_ptr.vmem [resolvable:$false] %s2011_s28 }
  0x45   : > { %s2013_s12 = scalar_lea.vmem %s2012_s28, 2048  ;;  %p2014_p3 = scmp.lt.s32.totalorder %s2271_s29, %s2012_s28 }
  0x46   : > { %p2009_p10 = pnand %p2007_p8, %p1993_p0  ;;  %p2015_p7 = scmp.lt.s32.totalorder %s2013_s12, %s2006_s5 }
  0x48   : > { %p2010_p13 = pneg %p2009_p10  ;;  %p2016_p9 = por %p2015_p7, %p2014_p3 }
  0x4a   : > { %p2017_p1 = pnand %p2016_p9, %p2010_p13 }
  0x4c   : > { %2020 = shalt.err (!%p2017_p1)
}
  0x4d   : > { %s2131_s11 = smov 128   ;;  %s2132_s13 = smov 8  }
  0x4e   : > { %1895 = dma.hbm_to_vmem [thread:$0]  (!%p2267_p11), %s2264_s25, 1024, %s2271_s29, %s2273_s10, %s2131_s11, %s2131_s11, %s2132_s13  }
  0x4f   : > { %s2309_s26 = scalar_lea.hbm %s2727_s1, %s1745_s6  ;;  %s203_s5 = scalar_lea.vmem [#allocation7], %s2257_s7 }
  0x50   : > { %s211_s8 = sshll.u32 %s203_s5, 4  ;;  %s199_s28 = sand.u32 1, %s2125_s18   ;;  %s2313_s8 = int_to_ptr.vmem [resolvable:$true] %s211_s8 }
  0x51   : > { %s2315_s12 = scalar_lea.sflag [#allocation8], %s199_s28  ;;  %s2021_s0 = scalar_lea.hbm %s2309_s26, 1024 }
  0x52   : > { %p2022_p5 = scmp.ne.s32.totalorder %s2309_s26, %s2021_s0  ;;  %s2026_s29 = scalar_lea.hbm %s2727_s1, 2048 }
  0x53   : > { %p2027_p6 = scmp.lt.u32.totalorder %s2309_s26, %s2727_s1  ;;  %p2028_p8 = scmp.lt.u32.totalorder %s2026_s29, %s2021_s0 }
  0x54   : > { %p2024_p2 = pnand %p2022_p5, %p1993_p0  ;;  %p2030_p13 = scmp.lt.u32.totalorder %s2021_s0, %s2309_s26 }
  0x55   : > { %p2029_p10 = por %p2028_p8, %p2027_p6 }
  0x56   : > { %p2025_p4 = pneg %p2024_p2 }
  0x57   : > { %p2031_p3 = por %p2030_p13, %p2029_p10 }
  0x59   : > { %p2032_p7 = pnand %p2031_p3, %p2025_p4 }
  0x5b   : > { %2035 = shalt.err (!%p2032_p7)
}
  0x5c   : > { %s2036_s7 = scalar_lea.vmem %s2313_s8, 1024  ;;  %s2133_s20 = smov [#allocation7]  }
  0x5d   : > { %p2037_p9 = scmp.ne.s32.totalorder %s2313_s8, %s2036_s7  ;;  %s2041_s5 = sshll.u32 %s2133_s20, 4  ;;  %s2042_s5 = int_to_ptr.vmem [resolvable:$false] %s2041_s5 }
  0x5e   : > { %s2043_s28 = scalar_lea.vmem %s2042_s5, 2048  ;;  %p2044_p2 = scmp.lt.s32.totalorder %s2313_s8, %s2042_s5 }
  0x5f   : > { %p2039_p1 = pnand %p2037_p9, %p1993_p0  ;;  %p2045_p6 = scmp.lt.s32.totalorder %s2043_s28, %s2036_s7 }
  0x61   : > { %p2040_p5 = pneg %p2039_p1  ;;  %p2046_p8 = por %p2045_p6, %p2044_p2 }
  0x63   : > { %p2047_p10 = pnand %p2046_p8, %p2040_p5 }
  0x65   : > { %2050 = shalt.err (!%p2047_p10)
}
  0x66   : > { %1898 = dma.hbm_to_vmem [thread:$0]  (!%p2267_p11), %s2309_s26, 1024, %s2313_s8, %s2315_s12, %s2131_s11, %s2131_s11, %s2132_s13  }
  0x67   : > { %p2743_p0 = scmp.ne.s32.totalorder %s2737_s23, 0 }
  0x68   : > { %s2347_s0 = sand.u32 (!%p2743_p0), 1, %s2117_s16   ;;  %p2744_p4 = scmp.ne.s32.totalorder (!%p2743_p0), %s2735_s21, 0 }
  0x69   : > { %223 = sbr.rel (%p2743_p0) target bundleno = 988 (0x3dc), region = 36  ;;  %s1686_s25 = sshll.u32 (!%p2743_p0), %s2347_s0, 6 }
  0x6a   : > { %s226_s6 = scalar_lea.sflag (!%p2743_p0), [#allocation5], %s2347_s0  ;;  %s229_s29 = scalar_lea.vmem (!%p2743_p0), [#allocation4], %s1686_s25 }
  0x70   : > { %2096 = dma.done.wait (%p2744_p4), %s226_s6, 1024  }
  0x71   : > { %2098 = vsyncadd (%p2744_p4), %s226_s6, 4294966272  ;;  %s234_s9 = sand.u32 1, %s2181_s19   ;;  %s2356_s23 = scalar_lea.vmem [#allocation7], %s1686_s25 }
  0x72   : > { %s235_s11 = scalar_lea.sflag [#allocation8], %s234_s9 }
  0x73   : > { %2100 = dma.done.wait (%p2744_p4), %s235_s11, 1024  }
  0x74   : > { %2102 = vsyncadd (%p2744_p4), %s235_s11, 4294966272  ;;  %p2745_p11 = scmp.eq.s32.totalorder %s2181_s19, 0 }
  0x76   : > { %2104 = dma.done.wait (%p2745_p11), [#allocation8], 128   ;;  %p2746_p13 = pmov %p2745_p11 }
  0x77   : > { %v1945_v0 = vld [vmem:[#allocation9] sm:$0xff]   ;;  %v2368_v2 = vld [vmem:[%s229_s29 + $0x8] sm:$0xff]  ;;  %vm347_vm0 = vcmask 130048   ;;  %v2370_v3 = vld [vmem:[%s229_s29 + $0x10] sm:$0xff]  ;;  %s1689_s26 = sshll.u32 %s2347_s0, 3  ;;  %s1741_s12 = sshll.u32 %s2181_s19, 7 }
  0x78   : > { %2106 = vsyncadd (%p2746_p13), [#allocation8], 4294967168  ;;  %v2366_v1 = vld [vmem:[%s229_s29] sm:$0xff]  ;;  %1790 = vmatprep.subr.bf16.mxu0 %v1945_v0  ;;  %v2374_v5 = vld [vmem:[%s229_s29 + $0x18] sm:$0xff]  ;;  %s271_s10 = scalar_lea.vmem [#allocation10], %s1689_s26  ;;  %s2682_s28 = scalar_lea.hbm %s2730_s4, %s1741_s12 }
  0x79   : > { %v372_v4 = vpack.c.bf16 %v2368_v2, %v2366_v1  ;;  %v2376_v6 = vld [vmem:[%s229_s29 + $0x20] sm:$0xff]  ;;  %v2378_v7 = vld [vmem:[%s229_s29 + $0x28] sm:$0xff]  ;;  %1791 = vmatpush3.bf16.msra.mxu0 %v1945_v0  ;;  %v373_v8 = vpack.c.bf16 %v2374_v5, %v2370_v3  ;;  %v2384_v10 = vld [vmem:[%s229_s29 + $0x30] sm:$0xff]  ;;  %s1571_s14 = sshll.u32 %s271_s10, 4  ;;  %s1558_s25 = scalar_lea.sflag [#allocation6], %s2347_s0  ;;  %s2684_s14 = int_to_ptr.vmem [resolvable:$true] %s1571_s14 }
  0x7a   : > { %v374_v9 = vpack.c.bf16 %v2378_v7, %v2376_v6  ;;  %v2386_v11 = vld [vmem:[%s229_s29 + $0x38] sm:$0xff]  ;;  %v2389_v12 = vld [vmem:[%s2356_s23] sm:$0xff]  ;;  %v2395_v14 = vld [vmem:[%s2356_s23 + $0x8] sm:$0xff]  ;;  %s2051_s19 = scalar_lea.vmem %s2684_s14, 128  ;;  %s2134_s6 = smov [#allocation10]  }
  0x7b   : > { %380 = vst.msk [vmem:[#allocation2] sm:$0xff] %vm347_vm0, %v372_v4  ;;  %v375_v13 = vpack.c.bf16 %v2386_v11, %v2384_v10  ;;  %v2398_v15 = vld [vmem:[%s2356_s23 + $0x10] sm:$0xff]  ;;  %v2401_v16 = vld [vmem:[%s2356_s23 + $0x18] sm:$0xff]  ;;  %v389_v17 = vmul.bf16 %v372_v4, %v372_v4  ;;  %381 = vst.msk [vmem:[#allocation2 + $0x8] sm:$0xff] %vm347_vm0, %v373_v8  ;;  %v376_v18 = vpack.c.bf16 %v2395_v14, %v2389_v12  ;;  %p2052_p3 = scmp.ne.s32.totalorder %s2684_s14, %s2051_s19  ;;  %s2055_s29 = sshll.u32 %s2134_s6, 4  ;;  %s2056_s29 = int_to_ptr.vmem [resolvable:$false] %s2055_s29 }
  0x7c   : > { %382 = vst.msk [vmem:[#allocation2 + $0x10] sm:$0xff] %vm347_vm0, %v374_v9  ;;  %v377_v19 = vpack.c.bf16 %v2401_v16, %v2398_v15  ;;  %v2410_v20 = vld [vmem:[%s2356_s23 + $0x20] sm:$0xff]  ;;  %v2413_v21 = vld [vmem:[%s2356_s23 + $0x28] sm:$0xff]  ;;  %v2416_v22 = vld [vmem:[%s2356_s23 + $0x30] sm:$0xff]  ;;  %v390_v23 = vmul.bf16 %v373_v8, %v373_v8  ;;  %v391_v24 = vmul.bf16 %v374_v9, %v374_v9  ;;  %s2057_s9 = scalar_lea.vmem %s2056_s29, 256  ;;  %p2058_p1 = scmp.lt.s32.totalorder %s2684_s14, %s2056_s29 }
  0x7d   : > { %383 = vst.msk [vmem:[#allocation2 + $0x18] sm:$0xff] %vm347_vm0, %v375_v13  ;;  %v378_v25 = vpack.c.bf16 %v2413_v21, %v2410_v20  ;;  %v2422_v26 = vld [vmem:[%s2356_s23 + $0x38] sm:$0xff]  ;;  %394 = vst.msk [vmem:[#allocation2 + $0x40] sm:$0xff] %vm347_vm0, %v389_v17  ;;  %v392_v27 = vmul.bf16 %v375_v13, %v375_v13  ;;  %v398_v29 = vmul.bf16 %v376_v18, %v376_v18  ;;  %v1946_v57 = vld [vmem:[%s2729_s3] sm:$0xff]   ;;  %p2053_p7 = pnand %p2052_p3, %p2251_p12  ;;  %p2059_p5 = scmp.lt.s32.totalorder %s2057_s9, %s2051_s19 }
  0x7e   : > { %385 = vst.msk [vmem:[#allocation2 + $0x20] sm:$0xff] %vm347_vm0, %v376_v18  ;;  %386 = vst.msk [vmem:[#allocation2 + $0x28] sm:$0xff] %vm347_vm0, %v377_v19  ;;  %v379_v28 = vpack.c.bf16 %v2422_v26, %v2416_v22  ;;  %v399_v30 = vmul.bf16 %v377_v19, %v377_v19  ;;  %v407_v31 = vmul.bf16 %v376_v18, %v372_v4  ;;  %1832 = vmatprep.subr.bf16.mxu1 %v1946_v57 }
  0x7f   : > { %395 = vst.msk [vmem:[#allocation2 + $0x48] sm:$0xff] %vm347_vm0, %v390_v23  ;;  %396 = vst.msk [vmem:[#allocation2 + $0x50] sm:$0xff] %vm347_vm0, %v391_v24  ;;  %v400_v32 = vmul.bf16 %v378_v25, %v378_v25  ;;  %v408_v33 = vmul.bf16 %v377_v19, %v373_v8  ;;  %v409_v34 = vmul.bf16 %v378_v25, %v374_v9  ;;  %1833 = vmatpush3.bf16.msra.mxu1 %v1946_v57  ;;  %p2054_p9 = pneg %p2053_p7  ;;  %p2060_p2 = por %p2059_p5, %p2058_p1 }
  0x80   : > { %387 = vst.msk [vmem:[#allocation2 + $0x30] sm:$0xff] %vm347_vm0, %v378_v25  ;;  %397 = vst.msk [vmem:[#allocation2 + $0x58] sm:$0xff] %vm347_vm0, %v392_v27  ;;  %v401_v35 = vmul.bf16 %v379_v28, %v379_v28  ;;  %v410_v36 = vmul.bf16 %v379_v28, %v375_v13 }
  0x81   : > { %388 = vst.msk [vmem:[#allocation2 + $0x38] sm:$0xff] %vm347_vm0, %v379_v28  ;;  %403 = vst.msk [vmem:[#allocation2 + $0x60] sm:$0xff] %vm347_vm0, %v398_v29  ;;  %p2061_p6 = pnand %p2060_p2, %p2054_p9 }
  0x82   : > { %404 = vst.msk [vmem:[#allocation2 + $0x68] sm:$0xff] %vm347_vm0, %v399_v30  ;;  %412 = vst.msk [vmem:[#allocation2 + $0x80] sm:$0xff] %vm347_vm0, %v407_v31  ;;  %v416_v37 = vld [vmem:[#allocation2] sm:$0xff]  ;;  %v417_v38 = vld [vmem:[#allocation2 + $0x8] sm:$0xff] }
  0x83   : > { %405 = vst.msk [vmem:[#allocation2 + $0x70] sm:$0xff] %vm347_vm0, %v400_v32  ;;  %413 = vst.msk [vmem:[#allocation2 + $0x88] sm:$0xff] %vm347_vm0, %v408_v33  ;;  %1792 = vmatprep.mubr.msk.bf16.mxu0 %vm347_vm0, %v416_v37  ;;  %v418_v39 = vld [vmem:[#allocation2 + $0x10] sm:$0xff] }
  0x84   : > { %414 = vst.msk [vmem:[#allocation2 + $0x90] sm:$0xff] %vm347_vm0, %v409_v34  ;;  %406 = vst.msk [vmem:[#allocation2 + $0x78] sm:$0xff] %vm347_vm0, %v401_v35  ;;  %1793 = vmatmul.mubr.msk.bf16.vlgmr.msra.gmra.mrb[0].mxu0 %vm347_vm0, %v417_v38  ;;  %v419_v40 = vld [vmem:[#allocation2 + $0x18] sm:$0xff]  ;;  %v424_v45 = vld [vmem:[#allocation2 + $0x40] sm:$0xff] }
  0x85   : > { %415 = vst.msk [vmem:[#allocation2 + $0x98] sm:$0xff] %vm347_vm0, %v410_v36  ;;  %1796 = vmatprep.mubr.msk.bf16.mxu0 %vm347_vm0, %v418_v39  ;;  %v420_v41 = vld [vmem:[#allocation2 + $0x20] sm:$0xff]  ;;  %v421_v42 = vld [vmem:[#allocation2 + $0x28] sm:$0xff] }
  0x86   : > { %v425_v46 = vld [vmem:[#allocation2 + $0x48] sm:$0xff]  ;;  %v426_v47 = vld [vmem:[#allocation2 + $0x50] sm:$0xff] }
  0x87   : > { %v422_v43 = vld [vmem:[#allocation2 + $0x30] sm:$0xff]  ;;  %v427_v48 = vld [vmem:[#allocation2 + $0x58] sm:$0xff] }
  0x88   : > { %v423_v44 = vld [vmem:[#allocation2 + $0x38] sm:$0xff]  ;;  %v428_v49 = vld [vmem:[#allocation2 + $0x60] sm:$0xff] }
  0x89   : > { %v429_v50 = vld [vmem:[#allocation2 + $0x68] sm:$0xff]  ;;  %v432_v53 = vld [vmem:[#allocation2 + $0x80] sm:$0xff] }
  0x8a   : > { %v430_v51 = vld [vmem:[#allocation2 + $0x70] sm:$0xff]  ;;  %v433_v54 = vld [vmem:[#allocation2 + $0x88] sm:$0xff] }
  0x8b   : > { %v431_v52 = vld [vmem:[#allocation2 + $0x78] sm:$0xff]  ;;  %v434_v55 = vld [vmem:[#allocation2 + $0x90] sm:$0xff] }
  0x8c   : > { %1797 = vmatmul.mubr.msk.bf16.gmra.mrb[4].mxu0 %vm347_vm0, %v419_v40  ;;  %v435_v56 = vld [vmem:[#allocation2 + $0x98] sm:$0xff] }
  0x8d   : > { %1800 = vmatprep.mubr.msk.bf16.mxu0 %vm347_vm0, %v420_v41 }
  0x94   : > { %1801 = vmatmul.mubr.msk.bf16.gmra.mrb[8].mxu0 %vm347_vm0, %v421_v42 }
  0x95   : > { %1804 = vmatprep.mubr.msk.bf16.mxu0 %vm347_vm0, %v422_v43 }
  0x9c   : > { %1805 = vmatmul.mubr.msk.bf16.gmra.mrb[12].mxu0 %vm347_vm0, %v423_v44 }
  0x9d   : > { %1808 = vmatprep.mubr.msk.bf16.mxu0 %vm347_vm0, %v424_v45 }
  0xa4   : > { %1809 = vmatmul.mubr.msk.bf16.gmra.mrb[16].mxu0 %vm347_vm0, %v425_v46 }
  0xa5   : > { %1812 = vmatprep.mubr.msk.bf16.mxu0 %vm347_vm0, %v426_v47 }
  0xac   : > { %1813 = vmatmul.mubr.msk.bf16.gmra.mrb[20].mxu0 %vm347_vm0, %v427_v48 }
  0xad   : > { %1816 = vmatprep.mubr.msk.bf16.mxu0 %vm347_vm0, %v428_v49 }
  0xb4   : > { %1817 = vmatmul.mubr.msk.bf16.gmra.mrb[24].mxu0 %vm347_vm0, %v429_v50 }
  0xb5   : > { %1820 = vmatprep.mubr.msk.bf16.mxu0 %vm347_vm0, %v430_v51 }
  0xbc   : > { %1821 = vmatmul.mubr.msk.bf16.gmra.mrb[28].mxu0 %vm347_vm0, %v431_v52 }
  0xbd   : > { %1824 = vmatprep.mubr.msk.bf16.mxu0 %vm347_vm0, %v432_v53 }
  0xc4   : > { %1825 = vmatmul.mubr.msk.bf16.gmra.mrb[32].mxu0 %vm347_vm0, %v433_v54 }
  0xc5   : > { %1828 = vmatprep.mubr.msk.bf16.mxu0 %vm347_vm0, %v434_v55 }
  0xcc   : > { %1829 = vmatmul.mubr.msk.bf16.gmra.mrb[36].mxu0 %vm347_vm0, %v435_v56 }
 0x157   : > { %v1794_v58 = vpop.f32.mrb[0].mxu0 }
 0x158   : > { %v538_v59 = vpop.f32.mrb[1].mxu0 }
 0x159   : > { %v1795_v60 = vpop.f32.mrb[2].mxu0 }
 0x15a   : > { %v698_v61 = vpack.c.bf16 %v1795_v60, %v1794_v58  ;;  %v541_v62 = vpop.f32.mrb[3].mxu0 }
 0x15b   : > { %v697_v63 = vpack.c.bf16 %v541_v62, %v538_v59 }
 0x15d   : > { %717 = vxpose.xlu0.c.b16.start.end [1/1] (short) (narrow) %v697_v63, 16 }
 0x15f   : > { %v1798_v0 = vpop.f32.mrb[4].mxu0 }
 0x160   : > { %v554_v4 = vpop.f32.mrb[5].mxu0 }
 0x161   : > { %733 = vxpose.xlu0.c.b16.start.end [1/1] (short) (narrow) %v698_v61, 16  ;;  %v1799_v8 = vpop.f32.mrb[6].mxu0 }
 0x162   : > { %v700_v9 = vpack.c.bf16 %v1799_v8, %v1798_v0  ;;  %v557_v13 = vpop.f32.mrb[7].mxu0 }
 0x163   : > { %v699_v17 = vpack.c.bf16 %v557_v13, %v554_v4 }
 0x165   : > { %749 = vxpose.xlu1.c.b16.start.end [1/1] (short) (narrow) %v699_v17, 16 }
 0x167   : > { %v1802_v18 = vpop.f32.mrb[8].mxu0 }
 0x168   : > { %v570_v19 = vpop.f32.mrb[9].mxu0 }
 0x169   : > { %765 = vxpose.xlu1.c.b16.start.end [1/1] (short) (narrow) %v700_v9, 16  ;;  %v1803_v23 = vpop.f32.mrb[10].mxu0 }
 0x16a   : > { %v702_v24 = vpack.c.bf16 %v1803_v23, %v1802_v18  ;;  %v573_v25 = vpop.f32.mrb[11].mxu0 }
 0x16b   : > { %v701_v27 = vpack.c.bf16 %v573_v25, %v570_v19 }
 0x16d   : > { %797 = vxpose.xlu1.c.b16.start.end [1/1] (short) (narrow) %v702_v24, 16  ;;  %781 = vxpose.xlu0.c.b16.start.end [1/1] (short) (narrow) %v701_v27, 16 }
 0x16f   : > { %v1806_v28 = vpop.f32.mrb[12].mxu0 }
 0x170   : > { %v586_v29 = vpop.f32.mrb[13].mxu0 }
 0x171   : > { %v1807_v30 = vpop.f32.mrb[14].mxu0 }
 0x172   : > { %v704_v31 = vpack.c.bf16 %v1807_v30, %v1806_v28  ;;  %v589_v32 = vpop.f32.mrb[15].mxu0 }
 0x173   : > { %v703_v33 = vpack.c.bf16 %v589_v32, %v586_v29 }
 0x174   : > { %829 = vxpose.xlu1.c.b16.start.end [1/1] (short) (narrow) %v704_v31, 16 }
 0x175   : > { %813 = vxpose.xlu0.c.b16.start.end [1/1] (short) (narrow) %v703_v33, 16 }
 0x177   : > { %v1810_v34 = vpop.f32.mrb[16].mxu0 }
 0x178   : > { %v602_v35 = vpop.f32.mrb[17].mxu0 }
 0x179   : > { %v1811_v36 = vpop.f32.mrb[18].mxu0 }
 0x17a   : > { %v706_v37 = vpack.c.bf16 %v1811_v36, %v1810_v34  ;;  %v605_v38 = vpop.f32.mrb[19].mxu0 }
 0x17b   : > { %v705_v39 = vpack.c.bf16 %v605_v38, %v602_v35 }
 0x17c   : > { %861 = vxpose.xlu1.c.b16.start.end [1/1] (short) (narrow) %v706_v37, 16 }
 0x17d   : > { %845 = vxpose.xlu0.c.b16.start.end [1/1] (short) (narrow) %v705_v39, 16 }
 0x17f   : > { %v1814_v40 = vpop.f32.mrb[20].mxu0 }
 0x180   : > { %v618_v41 = vpop.f32.mrb[21].mxu0 }
 0x181   : > { %v1815_v42 = vpop.f32.mrb[22].mxu0 }
 0x182   : > { %v708_v43 = vpack.c.bf16 %v1815_v42, %v1814_v40  ;;  %v621_v44 = vpop.f32.mrb[23].mxu0  ;;  %v291_v42 = vsub.f32 %v2366_v1, %v2389_v12  ;;  %v297_v1 = vsub.f32 %v2384_v10, %v2416_v22 }
 0x183   : > { %v707_v45 = vpack.c.bf16 %v621_v44, %v618_v41  ;;  %v293_v44 = vsub.f32 %v2370_v3, %v2398_v15 }
 0x184   : > { %893 = vxpose.xlu1.c.b16.start.end [1/1] (short) (narrow) %v708_v43, 16  ;;  %v292_v43 = vsub.f32 %v2368_v2, %v2395_v14  ;;  %v298_v2 = vsub.f32 %v2386_v11, %v2422_v26  ;;  %v315_v12 = vmul.f32 0.5, %v291_v42  ;;  %v305_v22 = vand.u32 2147483647, %v297_v1 }
 0x185   : > { %877 = vxpose.xlu0.c.b16.start.end [1/1] (short) (narrow) %v707_v45, 16  ;;  %v294_v45 = vsub.f32 %v2374_v5, %v2401_v16  ;;  %v301_v14 = vand.u32 2147483647, %v293_v44 }
 0x186   : > { %v316_v3 = vmul.f32 0.5, %v292_v43  ;;  %v323_v11 = vmul.f32 %v315_v12, %v291_v42  ;;  %vm313_vm7 = vcmp.lt.f32.partialorder %v305_v22, 1.0 }
 0x187   : > { %v1818_v46 = vpop.f32.mrb[24].mxu0  ;;  %v302_v15 = vand.u32 2147483647, %v294_v45  ;;  %vm2509_vm3 = vcmp.lt.f32.partialorder %v301_v14, 1.0 }
 0x188   : > { %v634_v47 = vpop.f32.mrb[25].mxu0  ;;  %v324_v26 = vmul.f32 %v316_v3, %v292_v43 }
 0x189   : > { %v1819_v48 = vpop.f32.mrb[26].mxu0  ;;  %vm2513_vm4 = vcmp.lt.f32.partialorder %v302_v15, 1.0 }
 0x18a   : > { %v710_v49 = vpack.c.bf16 %v1819_v48, %v1818_v46  ;;  %v637_v50 = vpop.f32.mrb[27].mxu0  ;;  %v299_v46 = vand.u32 2147483647, %v291_v42  ;;  %v295_v48 = vsub.f32 %v2376_v6, %v2410_v20  ;;  %v317_v6 = vmul.f32 0.5, %v293_v44 }
 0x18b   : > { %v709_v51 = vpack.c.bf16 %v637_v50, %v634_v47  ;;  %v300_v47 = vand.u32 2147483647, %v292_v43  ;;  %v306_v50 = vand.u32 2147483647, %v298_v2 }
 0x18c   : > { %925 = vxpose.xlu1.c.b16.start.end [1/1] (short) (narrow) %v710_v49, 16  ;;  %v296_v49 = vsub.f32 %v2378_v7, %v2413_v21  ;;  %vm2501_vm1 = vcmp.lt.f32.partialorder %v299_v46, 1.0  ;;  %v303_v7 = vand.u32 2147483647, %v295_v48  ;;  %v318_v21 = vmul.f32 0.5, %v294_v45 }
 0x18d   : > { %909 = vxpose.xlu0.c.b16.start.end [1/1] (short) (narrow) %v709_v51, 16  ;;  %vm2505_vm2 = vcmp.lt.f32.partialorder %v300_v47, 1.0  ;;  %v319_v10 = vmul.f32 0.5, %v295_v48  ;;  %vm314_vm8 = vcmp.lt.f32.partialorder %v306_v50, 1.0 }
 0x18e   : > { %v304_v20 = vand.u32 2147483647, %v296_v49  ;;  %v320_v51 = vmul.f32 0.5, %v296_v49  ;;  %vm2517_vm5 = vcmp.lt.f32.partialorder %v303_v7, 1.0 }
 0x18f   : > { %v1822_v52 = vpop.f32.mrb[28].mxu0 }
 0x190   : > { %v650_v53 = vpop.f32.mrb[29].mxu0  ;;  %vm2529_vm6 = vcmp.lt.f32.partialorder %v304_v20, 1.0 }
 0x191   : > { %v1823_v54 = vpop.f32.mrb[30].mxu0 }
 0x192   : > { %v712_v55 = vpack.c.bf16 %v1823_v54, %v1822_v52  ;;  %v653_v56 = vpop.f32.mrb[31].mxu0  ;;  %v325_v52 = vmul.f32 %v317_v6, %v293_v44  ;;  %v1690_v54 = vadd.f32 -0.5, %v299_v46 }
 0x193   : > { %v711_v57 = vpack.c.bf16 %v653_v56, %v650_v53  ;;  %v326_v53 = vmul.f32 %v318_v21, %v294_v45 }
 0x194   : > { %957 = vxpose.xlu1.c.b16.start.end [1/1] (short) (narrow) %v712_v55, 16 }
 0x195   : > { %941 = vxpose.xlu0.c.b16.start.end [1/1] (short) (narrow) %v711_v57, 16  ;;  %v321_v57 = vmul.f32 0.5, %v297_v1 }
 0x197   : > { %v1826_v58 = vpop.f32.mrb[32].mxu0 }
 0x198   : > { %v666_v59 = vpop.f32.mrb[33].mxu0 }
 0x199   : > { %v1827_v60 = vpop.f32.mrb[34].mxu0 }
 0x19a   : > { %v714_v61 = vpack.c.bf16 %v1827_v60, %v1826_v58  ;;  %v669_v62 = vpop.f32.mrb[35].mxu0  ;;  %v1691_v58 = vadd.f32 -0.5, %v300_v47  ;;  %v1692_v60 = vadd.f32 -0.5, %v301_v14 }
 0x19b   : > { %v713_v63 = vpack.c.bf16 %v669_v62, %v666_v59  ;;  %v327_v59 = vmul.f32 %v319_v10, %v295_v48  ;;  %v1694_v62 = vadd.f32 -0.5, %v303_v7 }
 0x19c   : > { %989 = vxpose.xlu1.c.b16.start.end [1/1] (short) (narrow) %v714_v61, 16  ;;  %v1693_v61 = vadd.f32 -0.5, %v302_v15 }
 0x19d   : > { %973 = vxpose.xlu0.c.b16.start.end [1/1] (short) (narrow) %v713_v63, 16 }
 0x19f   : > { %v1830_v0 = vpop.f32.mrb[36].mxu0 }
 0x1a0   : > { %v682_v4 = vpop.f32.mrb[37].mxu0 }
 0x1a1   : > { %v1831_v8 = vpop.f32.mrb[38].mxu0 }
 0x1a2   : > { %v716_v9 = vpack.c.bf16 %v1831_v8, %v1830_v0  ;;  %v685_v13 = vpop.f32.mrb[39].mxu0  ;;  %v322_v0 = vmul.f32 0.5, %v298_v2  ;;  %v340_v8 = vsel %vm2505_vm2, %v324_v26, %v1691_v58 }
 0x1a3   : > { %v715_v17 = vpack.c.bf16 %v685_v13, %v682_v4  ;;  %v339_v4 = vsel %vm2501_vm1, %v323_v11, %v1690_v54  ;;  %v1695_v13 = vadd.f32 -0.5, %v304_v20 }
 0x1a4   : > { %1021 = vxpose.xlu1.c.b16.start.end [1/1] (short) (narrow) %v716_v9, 16  ;;  %v328_v9 = vmul.f32 %v320_v51, %v296_v49 }
 0x1a5   : > { %1005 = vxpose.xlu0.c.b16.start.end [1/1] (short) (narrow) %v715_v17, 16  ;;  %v341_v17 = vsel %vm2509_vm3, %v325_v52, %v1692_v60 }
 0x1c3   : > { %v725_v18 = vpop.trf.xlu0 }
 0x1c4   : > { %1834 = vmatprep.mubr.msk.bf16.mxu1 %vm347_vm0, %v725_v18  ;;  %v342_v18 = vsel %vm2513_vm4, %v326_v53, %v1693_v61 }
 0x1c7   : > { %v741_v19 = vpop.trf.xlu0 }
 0x1c8   : > { %1835 = vmatmul.mubr.msk.bf16.vlgmr.msra.gmra.mrb[0].mxu1 %vm347_vm0, %v741_v19 }
 0x1cb   : > { %v757_v23 = vpop.trf.xlu1 }
 0x1cc   : > { %1838 = vmatprep.mubr.msk.bf16.mxu1 %vm347_vm0, %v757_v23  ;;  %v329_v23 = vmul.f32 %v321_v57, %v297_v1 }
 0x1cf   : > { %v773_v24 = vpop.trf.xlu1 }
 0x1d0   : > { %1839 = vmatmul.mubr.msk.bf16.gmra.mrb[4].mxu1 %vm347_vm0, %v773_v24  ;;  %v348_v24 = vsel %vm347_vm0, %v339_v4, 0.0 }
 0x1d3   : > { %v789_v25 = vpop.trf.xlu0  ;;  %v805_v27 = vpop.trf.xlu1 }
 0x1d4   : > { %1842 = vmatprep.mubr.msk.bf16.mxu1 %vm347_vm0, %v789_v25  ;;  %v349_v25 = vsel %vm347_vm0, %v340_v8, 0.0 }
 0x1d8   : > { %1843 = vmatmul.mubr.msk.bf16.gmra.mrb[8].mxu1 %vm347_vm0, %v805_v27  ;;  %v1696_v27 = vadd.f32 -0.5, %v305_v22 }
 0x1da   : > { %v837_v29 = vpop.trf.xlu1 }
 0x1db   : > { %v821_v28 = vpop.trf.xlu0 }
 0x1dc   : > { %1846 = vmatprep.mubr.msk.bf16.mxu1 %vm347_vm0, %v821_v28  ;;  %v343_v28 = vsel %vm2517_vm5, %v327_v59, %v1694_v62 }
 0x1e0   : > { %1847 = vmatmul.mubr.msk.bf16.gmra.mrb[12].mxu1 %vm347_vm0, %v837_v29  ;;  %v350_v29 = vadd.f32 %v349_v25, %v348_v24 }
 0x1e2   : > { %v869_v31 = vpop.trf.xlu1 }
 0x1e3   : > { %v853_v30 = vpop.trf.xlu0 }
 0x1e4   : > { %1850 = vmatprep.mubr.msk.bf16.mxu1 %vm347_vm0, %v853_v30  ;;  %v351_v30 = vsel %vm347_vm0, %v341_v17, 0.0 }
 0x1e8   : > { %1851 = vmatmul.mubr.msk.bf16.gmra.mrb[16].mxu1 %vm347_vm0, %v869_v31  ;;  %v353_v31 = vsel %vm347_vm0, %v342_v18, 0.0 }
 0x1ea   : > { %v901_v33 = vpop.trf.xlu1 }
 0x1eb   : > { %v885_v32 = vpop.trf.xlu0 }
 0x1ec   : > { %1854 = vmatprep.mubr.msk.bf16.mxu1 %vm347_vm0, %v885_v32  ;;  %v330_v32 = vmul.f32 %v322_v0, %v298_v2 }
 0x1f0   : > { %1855 = vmatmul.mubr.msk.bf16.gmra.mrb[20].mxu1 %vm347_vm0, %v901_v33  ;;  %v1697_v33 = vadd.f32 -0.5, %v306_v50 }
 0x1f2   : > { %v933_v35 = vpop.trf.xlu1 }
 0x1f3   : > { %v917_v34 = vpop.trf.xlu0 }
 0x1f4   : > { %1858 = vmatprep.mubr.msk.bf16.mxu1 %vm347_vm0, %v917_v34  ;;  %v344_v34 = vsel %vm2529_vm6, %v328_v9, %v1695_v13 }
 0x1f8   : > { %1859 = vmatmul.mubr.msk.bf16.gmra.mrb[24].mxu1 %vm347_vm0, %v933_v35  ;;  %v352_v35 = vadd.f32 %v351_v30, %v350_v29 }
 0x1fa   : > { %v965_v37 = vpop.trf.xlu1 }
 0x1fb   : > { %v949_v36 = vpop.trf.xlu0 }
 0x1fc   : > { %1862 = vmatprep.mubr.msk.bf16.mxu1 %vm347_vm0, %v949_v36  ;;  %v355_v36 = vsel %vm347_vm0, %v343_v28, 0.0 }
 0x200   : > { %1863 = vmatmul.mubr.msk.bf16.gmra.mrb[28].mxu1 %vm347_vm0, %v965_v37  ;;  %v345_v37 = vsel %vm313_vm7, %v329_v23, %v1696_v27 }
 0x201   : > { %v359_v42 = vsel %vm347_vm0, %v345_v37, 0.0 }
 0x202   : > { %v997_v39 = vpop.trf.xlu1 }
 0x203   : > { %v981_v38 = vpop.trf.xlu0 }
 0x204   : > { %1866 = vmatprep.mubr.msk.bf16.mxu1 %vm347_vm0, %v981_v38  ;;  %v354_v38 = vadd.f32 %v353_v31, %v352_v35 }
 0x208   : > { %1867 = vmatmul.mubr.msk.bf16.gmra.mrb[32].mxu1 %vm347_vm0, %v997_v39  ;;  %v357_v39 = vsel %vm347_vm0, %v344_v34, 0.0 }
 0x20a   : > { %v1029_v41 = vpop.trf.xlu1 }
 0x20b   : > { %v1013_v40 = vpop.trf.xlu0 }
 0x20c   : > { %1870 = vmatprep.mubr.msk.bf16.mxu1 %vm347_vm0, %v1013_v40  ;;  %v346_v40 = vsel %vm314_vm8, %v330_v32, %v1697_v33 }
 0x20d   : > { %v361_v44 = vsel %vm347_vm0, %v346_v40, 0.0 }
 0x210   : > { %1871 = vmatmul.mubr.msk.bf16.gmra.mrb[36].mxu1 %vm347_vm0, %v1029_v41  ;;  %v356_v41 = vadd.f32 %v355_v36, %v354_v38 }
 0x212   : > { %v358_v43 = vadd.f32 %v357_v39, %v356_v41 }
 0x214   : > { %v360_v45 = vadd.f32 %v359_v42, %v358_v43 }
 0x216   : > { %v362_v46 = vadd.f32 %v361_v44, %v360_v45 }
 0x218   : > { %363 = vadd.xlane.f32.xlu0 %v362_v46 }
 0x29b   : > { %v1836_v47 = vpop.f32.mrb[0].mxu1 }
 0x29c   : > { %1300 = vst.msk [vmem:[#allocation3 + $0x10] sm:$0xff] %vm347_vm0, %v1836_v47  ;;  %v1139_v48 = vpop.f32.mrb[1].mxu1 }
 0x29d   : > { %1298 = vst.msk [vmem:[#allocation3] sm:$0xff] %vm347_vm0, %v1139_v48  ;;  %v1837_v49 = vpop.f32.mrb[2].mxu1 }
 0x29e   : > { %1301 = vst.msk [vmem:[#allocation3 + $0x18] sm:$0xff] %vm347_vm0, %v1837_v49  ;;  %v1142_v1 = vpop.f32.mrb[3].mxu1 }
 0x29f   : > { %1299 = vst.msk [vmem:[#allocation3 + $0x8] sm:$0xff] %vm347_vm0, %v1142_v1 }
 0x2a3   : > { %v1840_v2 = vpop.f32.mrb[4].mxu1  ;;  %v1340_v59 = vld [vmem:[#allocation3 + $0x10] sm:$0xff] }
 0x2a4   : > { %1304 = vst.msk [vmem:[#allocation3 + $0x30] sm:$0xff] %vm347_vm0, %v1840_v2  ;;  %v1155_v12 = vpop.f32.mrb[5].mxu1  ;;  %v1338_v0 = vld [vmem:[#allocation3] sm:$0xff]  ;;  %v1384_v23 = vmul.f32 %v1340_v59, %v1340_v59 }
 0x2a5   : > { %1302 = vst.msk [vmem:[#allocation3 + $0x20] sm:$0xff] %vm347_vm0, %v1155_v12  ;;  %v1841_v14 = vpop.f32.mrb[6].mxu1  ;;  %v1341_v4 = vld [vmem:[#allocation3 + $0x18] sm:$0xff]  ;;  %v1382_v28 = vmul.f32 %v1338_v0, %v1338_v0 }
 0x2a6   : > { %1305 = vst.msk [vmem:[#allocation3 + $0x38] sm:$0xff] %vm347_vm0, %v1841_v14  ;;  %v1158_v3 = vpop.f32.mrb[7].mxu1  ;;  %v1339_v9 = vld [vmem:[#allocation3 + $0x8] sm:$0xff]  ;;  %v1385_v29 = vmul.f32 %v1341_v4, %v1341_v4 }
 0x2a7   : > { %1303 = vst.msk [vmem:[#allocation3 + $0x28] sm:$0xff] %vm347_vm0, %v1158_v3  ;;  %v1383_v35 = vmul.f32 %v1339_v9, %v1339_v9 }
 0x2ab   : > { %v1844_v15 = vpop.f32.mrb[8].mxu1  ;;  %v2575_v13 = vld [vmem:[#allocation3 + $0x30] sm:$0xff] }
 0x2ac   : > { %1308 = vst.msk [vmem:[#allocation3 + $0x50] sm:$0xff] %vm347_vm0, %v1844_v15  ;;  %v1171_v5 = vpop.f32.mrb[9].mxu1  ;;  %v2584_v36 = vmul.f32 %v2575_v13, %v2575_v13  ;;  %v2591_v47 = vld [vmem:[#allocation3 + $0x20] sm:$0xff] }
 0x2ad   : > { %1306 = vst.msk [vmem:[#allocation3 + $0x40] sm:$0xff] %vm347_vm0, %v1171_v5  ;;  %v1845_v16 = vpop.f32.mrb[10].mxu1  ;;  %v2593_v48 = vld [vmem:[#allocation3 + $0x38] sm:$0xff] }
 0x2ae   : > { %1309 = vst.msk [vmem:[#allocation3 + $0x58] sm:$0xff] %vm347_vm0, %v1845_v16  ;;  %v1174_v6 = vpop.f32.mrb[11].mxu1 }
 0x2af   : > { %1307 = vst.msk [vmem:[#allocation3 + $0x48] sm:$0xff] %vm347_vm0, %v1174_v6 }
 0x2b3   : > { %v1848_v7 = vpop.f32.mrb[12].mxu1  ;;  %v1349_v56 = vld [vmem:[#allocation3 + $0x50] sm:$0xff] }
 0x2b4   : > { %1312 = vst.msk [vmem:[#allocation3 + $0x70] sm:$0xff] %vm347_vm0, %v1848_v7  ;;  %v1187_v20 = vpop.f32.mrb[13].mxu1  ;;  %v1347_v60 = vld [vmem:[#allocation3 + $0x40] sm:$0xff]  ;;  %v2572_v63 = vmul.f32 %v1349_v56, %v1340_v59  ;;  %v1392_v8 = vmul.f32 %v1349_v56, %v1349_v56 }
 0x2b5   : > { %1310 = vst.msk [vmem:[#allocation3 + $0x60] sm:$0xff] %vm347_vm0, %v1187_v20  ;;  %v1849_v21 = vpop.f32.mrb[14].mxu1  ;;  %v1350_v62 = vld [vmem:[#allocation3 + $0x58] sm:$0xff]  ;;  %v1390_v18 = vmul.f32 %v1347_v60, %v1347_v60  ;;  %v2577_v19 = vmul.f32 %v1347_v60, %v1338_v0 }
 0x2b6   : > { %1313 = vst.msk [vmem:[#allocation3 + $0x78] sm:$0xff] %vm347_vm0, %v1849_v21  ;;  %v1190_v10 = vpop.f32.mrb[15].mxu1  ;;  %v1348_v17 = vld [vmem:[#allocation3 + $0x48] sm:$0xff]  ;;  %v2579_v24 = vmul.f32 %v1350_v62, %v1341_v4  ;;  %v1393_v30 = vmul.f32 %v1350_v62, %v1350_v62  ;;  %v1432_v31 = vmul.f32 2.0, %v2572_v63  ;;  %v1472_v38 = vadd.f32 %v1392_v8, %v1384_v23 }
 0x2b7   : > { %1311 = vst.msk [vmem:[#allocation3 + $0x68] sm:$0xff] %vm347_vm0, %v1190_v10  ;;  %v1391_v37 = vmul.f32 %v1348_v17, %v1348_v17  ;;  %v2587_v42 = vmul.f32 %v1348_v17, %v1339_v9  ;;  %v1430_v44 = vmul.f32 2.0, %v2577_v19  ;;  %v1470_v45 = vadd.f32 %v1390_v18, %v1382_v28 }
 0x2b8   : > { %v1433_v14 = vmul.f32 2.0, %v2579_v24  ;;  %v2597_v6 = vadd.f32 0.0001, %v1432_v31  ;;  %v1473_v7 = vadd.f32 %v1393_v30, %v1385_v29 }
 0x2b9   : > { %v1471_v4 = vadd.f32 %v1391_v37, %v1383_v35 }
 0x2bb   : > { %v1852_v22 = vpop.f32.mrb[16].mxu1  ;;  %v2600_v20 = vld [vmem:[#allocation3 + $0x70] sm:$0xff] }
 0x2bc   : > { %1316 = vst.msk [vmem:[#allocation3 + $0x90] sm:$0xff] %vm347_vm0, %v1852_v22  ;;  %v1203_v50 = vpop.f32.mrb[17].mxu1  ;;  %v1396_v0 = vmul.f32 %v2600_v20, %v2600_v20 }
 0x2bd   : > { %1314 = vst.msk [vmem:[#allocation3 + $0x80] sm:$0xff] %vm347_vm0, %v1203_v50  ;;  %v1853_v11 = vpop.f32.mrb[18].mxu1  ;;  %v2616_v56 = vld [vmem:[#allocation3 + $0x78] sm:$0xff] }
 0x2be   : > { %1317 = vst.msk [vmem:[#allocation3 + $0x98] sm:$0xff] %vm347_vm0, %v1853_v11  ;;  %v1206_v26 = vpop.f32.mrb[19].mxu1  ;;  %v2602_v11 = vld [vmem:[#allocation3 + $0x28] sm:$0xff] }
 0x2bf   : > { %1315 = vst.msk [vmem:[#allocation3 + $0x88] sm:$0xff] %vm347_vm0, %v1206_v26  ;;  %v2604_v26 = vld [vmem:[#allocation3 + $0x60] sm:$0xff] }
 0x2c3   : > { %v1856_v51 = vpop.f32.mrb[20].mxu1  ;;  %v1358_v27 = vld [vmem:[#allocation3 + $0x90] sm:$0xff] }
 0x2c4   : > { %1320 = vst.msk [vmem:[#allocation3 + $0xb0] sm:$0xff] %vm347_vm0, %v1856_v51  ;;  %v1219_v52 = vpop.f32.mrb[21].mxu1  ;;  %v1356_v25 = vld [vmem:[#allocation3 + $0x80] sm:$0xff]  ;;  %v1408_v2 = vsub.f32 %v1358_v27, %v1384_v23  ;;  %v1386_v51 = vmul.f32 %v2591_v47, %v2591_v47  ;;  %v1394_v27 = vmul.f32 %v2604_v26, %v2604_v26 }
 0x2c5   : > { %1318 = vst.msk [vmem:[#allocation3 + $0xa0] sm:$0xff] %vm347_vm0, %v1219_v52  ;;  %v1857_v53 = vpop.f32.mrb[22].mxu1  ;;  %v1359_v33 = vld [vmem:[#allocation3 + $0x98] sm:$0xff]  ;;  %v1406_v1 = vsub.f32 %v1356_v25, %v1382_v28  ;;  %v2610_v52 = vmul.f32 %v2593_v48, %v2593_v48  ;;  %v1387_v25 = vmul.f32 %v2602_v11, %v2602_v11  ;;  %v1431_v28 = vmul.f32 2.0, %v2587_v42 }
 0x2c6   : > { %1321 = vst.msk [vmem:[#allocation3 + $0xb8] sm:$0xff] %vm347_vm0, %v1857_v53  ;;  %v1222_v54 = vpop.f32.mrb[23].mxu1  ;;  %v1357_v40 = vld [vmem:[#allocation3 + $0x88] sm:$0xff]  ;;  %v1409_v5 = vsub.f32 %v1359_v33, %v1385_v29  ;;  %v2612_v53 = vadd.f32 0.0001, %v1430_v44  ;;  %v1397_v33 = vmul.f32 %v2616_v56, %v2616_v56 }
 0x2c7   : > { %1319 = vst.msk [vmem:[#allocation3 + $0xa8] sm:$0xff] %vm347_vm0, %v1222_v54  ;;  %v1407_v21 = vsub.f32 %v1357_v40, %v1383_v35  ;;  %v1480_v54 = vadd.f32 0.0001, %v1472_v38 }
 0x2cb   : > { %v1860_v55 = vpop.f32.mrb[24].mxu1  ;;  %v1362_v62 = vld [vmem:[#allocation3 + $0xb0] sm:$0xff] }
 0x2cc   : > { %1324 = vst.msk [vmem:[#allocation3 + $0xd0] sm:$0xff] %vm347_vm0, %v1860_v55  ;;  %v1235_v57 = vpop.f32.mrb[25].mxu1  ;;  %v2614_v55 = vld [vmem:[#allocation3 + $0x68] sm:$0xff] }
 0x2cd   : > { %1322 = vst.msk [vmem:[#allocation3 + $0xc0] sm:$0xff] %vm347_vm0, %v1235_v57  ;;  %v1861_v58 = vpop.f32.mrb[26].mxu1  ;;  %v2618_v57 = vadd.f32 0.0001, %v1433_v14  ;;  %v1363_v38 = vld [vmem:[#allocation3 + $0xb8] sm:$0xff] }
 0x2ce   : > { %1325 = vst.msk [vmem:[#allocation3 + $0xd8] sm:$0xff] %vm347_vm0, %v1861_v58  ;;  %v1238_v61 = vpop.f32.mrb[27].mxu1  ;;  %v1478_v58 = vadd.f32 0.0001, %v1470_v45 }
 0x2cf   : > { %1323 = vst.msk [vmem:[#allocation3 + $0xc8] sm:$0xff] %vm347_vm0, %v1238_v61  ;;  %v1360_v61 = vld [vmem:[#allocation3 + $0xa0] sm:$0xff] }
 0x2d0   : > { %v1410_v40 = vsub.f32 %v1360_v61, %v1386_v51 }
 0x2d3   : > { %v1864_v32 = vpop.f32.mrb[28].mxu1  ;;  %v1367_v34 = vld [vmem:[#allocation3 + $0xd0] sm:$0xff] }
 0x2d4   : > { %1328 = vst.msk [vmem:[#allocation3 + $0xf0] sm:$0xff] %vm347_vm0, %v1864_v32  ;;  %v1251_v39 = vpop.f32.mrb[29].mxu1  ;;  %v1365_v41 = vld [vmem:[#allocation3 + $0xc0] sm:$0xff]  ;;  %v1416_v43 = vsub.f32 %v1367_v34, %v1392_v8  ;;  %v1481_v8 = vadd.f32 0.0001, %v1473_v7  ;;  %v1395_v32 = vmul.f32 %v2614_v55, %v2614_v55 }
 0x2d5   : > { %1326 = vst.msk [vmem:[#allocation3 + $0xe0] sm:$0xff] %vm347_vm0, %v1251_v39  ;;  %v1865_v46 = vpop.f32.mrb[30].mxu1  ;;  %v1368_v49 = vld [vmem:[#allocation3 + $0xd8] sm:$0xff]  ;;  %v1414_v12 = vsub.f32 %v1365_v41, %v1390_v18  ;;  %v1361_v18 = vld [vmem:[#allocation3 + $0xa8] sm:$0xff]  ;;  %v1412_v41 = vsub.f32 %v1362_v62, %v2584_v36  ;;  %v2637_v7 = vadd.f32 0.0001, %v1431_v28 }
 0x2d6   : > { %1329 = vst.msk [vmem:[#allocation3 + $0xf8] sm:$0xff] %vm347_vm0, %v1865_v46  ;;  %v1254_v3 = vpop.f32.mrb[31].mxu1  ;;  %v1366_v15 = vld [vmem:[#allocation3 + $0xc8] sm:$0xff]  ;;  %v1417_v16 = vsub.f32 %v1368_v49, %v1393_v30  ;;  %v1488_v50 = vadd.f32 %v1416_v43, %v1408_v2  ;;  %v1411_v49 = vsub.f32 %v1361_v18, %v1387_v25  ;;  %v1479_v2 = vadd.f32 0.0001, %v1471_v4 }
 0x2d7   : > { %1327 = vst.msk [vmem:[#allocation3 + $0xe8] sm:$0xff] %vm347_vm0, %v1254_v3  ;;  %v1415_v10 = vsub.f32 %v1366_v15, %v1391_v37  ;;  %v1486_v22 = vadd.f32 %v1414_v12, %v1406_v1 }
 0x2d8   : > { %v1489_v60 = vadd.f32 %v1417_v16, %v1409_v5  ;;  %v1496_v29 = vadd.f32 0.0009, %v1488_v50  ;;  %v1413_v16 = vsub.f32 %v1363_v38, %v2610_v52  ;;  %v1476_v50 = vadd.f32 %v1396_v0, %v2584_v36 }
 0x2d9   : > { %v1487_v59 = vadd.f32 %v1415_v10, %v1407_v21  ;;  %v1494_v9 = vadd.f32 0.0009, %v1486_v22  ;;  %v1474_v21 = vadd.f32 %v1394_v27, %v1386_v51  ;;  %v1475_v22 = vadd.f32 %v1395_v32, %v1387_v25 }
 0x2da   : > { %v1497_v44 = vadd.f32 0.0009, %v1489_v60  ;;  %v1504_v5 = vmul.f32 %v1496_v29, %v1480_v54  ;;  %v1477_v51 = vadd.f32 %v1397_v33, %v2610_v52  ;;  %v1484_v25 = vadd.f32 0.0001, %v1476_v50 }
 0x2db   : > { %v1868_v17 = vpop.f32.mrb[32].mxu1  ;;  %v1371_v23 = vld [vmem:[#allocation3 + $0xf0] sm:$0xff]  ;;  %v1495_v35 = vadd.f32 0.0009, %v1487_v59  ;;  %v1502_v12 = vmul.f32 %v1494_v9, %v1478_v58  ;;  %v2642_v58 = vmul.f32 %v2600_v20, %v2575_v13  ;;  %v2646_v9 = vmul.f32 %v2604_v26, %v2591_v47 }
 0x2dc   : > { %1332 = vst.msk [vmem:[#allocation3 + $0x110] sm:$0xff] %vm347_vm0, %v1868_v17  ;;  %v1267_v30 = vpop.f32.mrb[33].mxu1  ;;  %v1369_v31 = vld [vmem:[#allocation3 + $0xe0] sm:$0xff]  ;;  %v1420_v34 = vsub.f32 %v1371_v23, %v1396_v0  ;;  %v1505_v60 = vmul.f32 %v1497_v44, %v1481_v8  ;;  %v1482_v20 = vadd.f32 0.0001, %v1474_v21 }
 0x2dd   : > { %1330 = vst.msk [vmem:[#allocation3 + $0x100] sm:$0xff] %vm347_vm0, %v1267_v30  ;;  %v1869_v37 = vpop.f32.mrb[34].mxu1  ;;  %v1372_v39 = vld [vmem:[#allocation3 + $0xf8] sm:$0xff]  ;;  %v1418_v43 = vsub.f32 %v1369_v31, %v1394_v27  ;;  %v1503_v10 = vmul.f32 %v1495_v35, %v1479_v2  ;;  %1947 = vrcp.f32 %v1502_v12  ;;  %v1483_v26 = vadd.f32 0.0001, %v1475_v22 }
 0x2de   : > { %1333 = vst.msk [vmem:[#allocation3 + $0x118] sm:$0xff] %vm347_vm0, %v1869_v37  ;;  %v1270_v45 = vpop.f32.mrb[35].mxu1  ;;  %v1370_v46 = vld [vmem:[#allocation3 + $0xe8] sm:$0xff]  ;;  %v1421_v1 = vsub.f32 %v1372_v39, %v1397_v33  ;;  %v1492_v15 = vadd.f32 %v1420_v34, %v1412_v41  ;;  %1949 = vrcp.f32 %v1504_v5  ;;  %v1405_v31 = vmul.f32 %v2616_v56, %v2593_v48 }
 0x2df   : > { %1331 = vst.msk [vmem:[#allocation3 + $0x108] sm:$0xff] %vm347_vm0, %v1270_v45  ;;  %v1419_v14 = vsub.f32 %v1370_v46, %v1395_v32  ;;  %v1490_v3 = vadd.f32 %v1418_v43, %v1410_v40  ;;  %1951 = vrcp.f32 %v1503_v10  ;;  %v1485_v37 = vadd.f32 0.0001, %v1477_v51 }
 0x2e0   : > { %v1493_v61 = vadd.f32 %v1421_v1, %v1413_v16  ;;  %v1500_v17 = vadd.f32 0.0009, %v1492_v15  ;;  %1953 = vrcp.f32 %v1505_v60  ;;  %v1403_v39 = vmul.f32 %v2614_v55, %v2602_v11 }
 0x2e1   : > { %v1491_v59 = vadd.f32 %v1419_v14, %v1411_v49  ;;  %v1498_v62 = vadd.f32 0.0009, %v1490_v3  ;;  %v1434_v43 = vmul.f32 2.0, %v2646_v9  ;;  %v1437_v55 = vmul.f32 2.0, %v1405_v31 }
 0x2e2   : > { %v1508_v33 = vmul.f32 %v1500_v17, %v1484_v25  ;;  %v1435_v10 = vmul.f32 2.0, %v1403_v39 }
 0x2e3   : > { %v1872_v4 = vpop.f32.mrb[36].mxu1  ;;  %v1376_v54 = vld [vmem:[#allocation3 + $0x110] sm:$0xff]  ;;  %v1499_v8 = vadd.f32 0.0009, %v1491_v59  ;;  %v1506_v30 = vmul.f32 %v1498_v62, %v1482_v20 }
 0x2e4   : > { %1336 = vst.msk [vmem:[#allocation3 + $0x130] sm:$0xff] %vm347_vm0, %v1872_v4  ;;  %v1283_v36 = vpop.f32.mrb[37].mxu1  ;;  %v1374_v0 = vld [vmem:[#allocation3 + $0x100] sm:$0xff]  ;;  %v1424_v13 = vsub.f32 %v1376_v54, %v2572_v63  ;;  %v1501_v63 = vadd.f32 0.0009, %v1493_v61 }
 0x2e5   : > { %1334 = vst.msk [vmem:[#allocation3 + $0x120] sm:$0xff] %vm347_vm0, %v1283_v36  ;;  %v1873_v18 = vpop.f32.mrb[38].mxu1  ;;  %v1377_v23 = vld [vmem:[#allocation3 + $0x118] sm:$0xff]  ;;  %v1422_v47 = vsub.f32 %v1374_v0, %v2577_v19  ;;  %v1507_v38 = vmul.f32 %v1499_v8, %v1483_v26  ;;  %1955 = vrcp.f32 %v1506_v30  ;;  %v1442_v61 = vadd.f32 0.0001, %v1434_v43 }
 0x2e6   : > { %1337 = vst.msk [vmem:[#allocation3 + $0x138] sm:$0xff] %vm347_vm0, %v1873_v18  ;;  %v1286_v52 = vpop.f32.mrb[39].mxu1  ;;  %v1375_v27 = vld [vmem:[#allocation3 + $0x108] sm:$0xff]  ;;  %v1425_v28 = vsub.f32 %v1377_v23, %v2579_v24  ;;  %v1448_v29 = vmul.f32 2.0, %v1424_v13  ;;  %v1436_v24 = vmul.f32 2.0, %v2642_v58  ;;  %v1509_v45 = vmul.f32 %v1501_v63, %v1485_v37 }
 0x2e7   : > { %1335 = vst.msk [vmem:[#allocation3 + $0x128] sm:$0xff] %vm347_vm0, %v1286_v52  ;;  %v1423_v32 = vsub.f32 %v1375_v27, %v2587_v42  ;;  %v1446_v19 = vmul.f32 2.0, %v1422_v47  ;;  %1957 = vrcp.f32 %v1508_v33  ;;  %v1948_v49 = vpop.eup %1947  ;;  %v1443_v36 = vadd.f32 0.0001, %v1435_v10 }
 0x2e8   : > { %v1449_v34 = vmul.f32 2.0, %v1425_v28  ;;  %v1456_v35 = vadd.f32 0.0009, %v1448_v29  ;;  %1959 = vrcp.f32 %v1507_v38  ;;  %v1950_v12 = vpop.eup %1949  ;;  %v1444_v15 = vadd.f32 0.0001, %v1436_v24 }
 0x2e9   : > { %v1447_v40 = vmul.f32 2.0, %v1423_v32  ;;  %v1454_v41 = vadd.f32 0.0009, %v1446_v19  ;;  %1961 = vrcp.f32 %v1509_v45  ;;  %v1445_v0 = vadd.f32 0.0001, %v1437_v55 }
 0x2ea   : > { %v1457_v44 = vadd.f32 0.0009, %v1449_v34  ;;  %v1464_v46 = vmul.f32 %v1456_v35, %v2597_v6 }
 0x2eb   : > { %v1380_v48 = vld [vmem:[#allocation3 + $0x130] sm:$0xff]  ;;  %v1455_v42 = vadd.f32 0.0009, %v1447_v40  ;;  %v1462_v56 = vmul.f32 %v1454_v41, %v2612_v53  ;;  %v1952_v53 = vpop.eup %1951 }
 0x2ec   : > { %v1378_v1 = vld [vmem:[#allocation3 + $0x120] sm:$0xff]  ;;  %v1428_v11 = vsub.f32 %v1380_v48, %v2642_v58  ;;  %v1465_v2 = vmul.f32 %v1457_v44, %v2618_v57  ;;  %v1954_v50 = vpop.eup %1953  ;;  %v1520_v57 = vmul.f32 %v1950_v12, %v1464_v46  ;;  %v364_v44 = vpop.xlane.xlu0 %363 }
 0x2ed   : > { %v1381_v14 = vld [vmem:[#allocation3 + $0x138] sm:$0xff]  ;;  %v1426_v3 = vsub.f32 %v1378_v1, %v2646_v9  ;;  %v1463_v5 = vmul.f32 %v1455_v42, %v2637_v7  ;;  %v1518_v16 = vmul.f32 %v1948_v49, %v1462_v56  ;;  %v365_v45 = vrot.slane %v364_v44, 4 }
 0x2ee   : > { %v1379_v21 = vld [vmem:[#allocation3 + $0x128] sm:$0xff]  ;;  %v1429_v6 = vsub.f32 %v1381_v14, %v1405_v31  ;;  %v1452_v22 = vmul.f32 2.0, %v1428_v11  ;;  %v1521_v54 = vmul.f32 %v1954_v50, %v1465_v2  ;;  %v1529_v47 = vsel %vm347_vm0, %v1520_v57, 0.0 }
 0x2ef   : > { %v1427_v59 = vsub.f32 %v1379_v21, %v1403_v39  ;;  %v1450_v60 = vmul.f32 2.0, %v1426_v3  ;;  %v1519_v58 = vmul.f32 %v1952_v53, %v1463_v5  ;;  %v1526_v7 = vsel %vm347_vm0, %v1518_v16, 0.0  ;;  %v1956_v26 = vpop.eup %1955 }
 0x2f0   : > { %v1453_v62 = vmul.f32 2.0, %v1429_v6  ;;  %v1460_v4 = vadd.f32 0.0009, %v1452_v22  ;;  %v1531_v63 = vsel %vm347_vm0, %v1521_v54, 0.0  ;;  %v366_v48 = vadd.f32 %v365_v45, %v364_v44 }
 0x2f1   : > { %v1451_v9 = vmul.f32 2.0, %v1427_v59  ;;  %v1458_v51 = vadd.f32 0.0009, %v1450_v60  ;;  %v1527_v17 = vsel %vm347_vm0, %v1519_v58, 0.0  ;;  %v1958_v52 = vpop.eup %1957 }
 0x2f2   : > { %v1461_v13 = vadd.f32 0.0009, %v1453_v62  ;;  %v1528_v20 = vadd.f32 %v1527_v17, %v1526_v7  ;;  %v1468_v23 = vmul.f32 %v1460_v4, %v1444_v15  ;;  %v1960_v30 = vpop.eup %1959  ;;  %v367_v42 = vrot.slane %v366_v48, 2 }
 0x2f3   : > { %v1459_v8 = vadd.f32 0.0009, %v1451_v9  ;;  %v1466_v18 = vmul.f32 %v1458_v51, %v1442_v61  ;;  %v1962_v34 = vpop.eup %1961  ;;  %v1550_v15 = vlaneseq }
 0x2f4   : > { %v1530_v25 = vadd.f32 %v1529_v47, %v1528_v20  ;;  %v1469_v28 = vmul.f32 %v1461_v13, %v1445_v0  ;;  %v1524_v19 = vmul.f32 %v1958_v52, %v1468_v23  ;;  %v368_v56 = vadd.f32 %v367_v42, %v366_v48 }
 0x2f5   : > { %v1467_v27 = vmul.f32 %v1459_v8, %v1443_v36  ;;  %v1522_v29 = vmul.f32 %v1956_v26, %v1466_v18  ;;  %v1551_v5 = vshrl.u32 %v1550_v15, 7 }
 0x2f6   : > { %v1532_v31 = vadd.f32 %v1531_v63, %v1530_v25  ;;  %v1525_v37 = vmul.f32 %v1962_v34, %v1469_v28  ;;  %v1537_v24 = vsel %vm347_vm0, %v1524_v19, 0.0  ;;  %v369_v46 = vrot.slane %v368_v56, 1 }
 0x2f7   : > { %v1523_v32 = vmul.f32 %v1960_v30, %v1467_v27  ;;  %v1533_v33 = vsel %vm347_vm0, %v1522_v29, 0.0  ;;  %vm1552_vm9 = vcmp.eq.s32.totalorder %v1551_v5, 0 }
 0x2f8   : > { %v1534_v35 = vadd.f32 %v1533_v33, %v1532_v31  ;;  %v1539_v41 = vsel %vm347_vm0, %v1525_v37, 0.0  ;;  %v370_v49 = vadd.f32 %v369_v46, %v368_v56 }
 0x2f9   : > { %v1535_v38 = vsel %vm347_vm0, %v1523_v32, 0.0 }
 0x2fa   : > { %v1536_v39 = vadd.f32 %v1535_v38, %v1534_v35  ;;  %1874 = vpush %v370_v49 }
 0x2fc   : > { %v1538_v40 = vadd.f32 %v1537_v24, %v1536_v39 }
 0x2fe   : > { %v1540_v43 = vadd.f32 %v1539_v41, %v1538_v40 }
 0x300   : > { %1541 = vadd.xlane.f32.xlu1 %v1540_v43 }
 0x32b   : > { %s1875_s8 = spop %1874 }
 0x32c   : > { %v1553_v16 = vstv %s1875_s8 }
 0x38d   : > { %v1542_v1 = vpop.xlane.xlu1 %1541 }
 0x38e   : > { %v1543_v11 = vrot.slane %v1542_v1, 4 }
 0x390   : > { %v1544_v55 = vadd.f32 %v1543_v11, %v1542_v1 }
 0x392   : > { %v1545_v2 = vrot.slane %v1544_v55, 2 }
 0x394   : > { %v1546_v12 = vadd.f32 %v1545_v2, %v1544_v55 }
 0x396   : > { %v1547_v14 = vrot.slane %v1546_v12, 1 }
 0x398   : > { %v1548_v3 = vadd.f32 %v1547_v14, %v1546_v12 }
 0x39a   : > { %1876 = vpush %v1548_v3 }
 0x3cb   : > { %s1877_s7 = spop %1876 }
 0x3cc   : > { %v1554_v53 = vstv %s1877_s7 }
 0x3cd   : > { %v1555_v21 = vsel %vm1552_vm9, %v1553_v16, %v1554_v53 }
 0x3ce   : > { %1556 = vst [vmem:[%s271_s10] sm:$0xff] %v1555_v21 }
 0x3cf   : > { %2064 = shalt.err (!%p2061_p6)
}
 0x3d0   : > { %s2065_s0 = scalar_lea.hbm %s2682_s28, 128  ;;  %s2069_s21 = scalar_lea.hbm %s2730_s4, 256 }
 0x3d1   : > { %p2066_p8 = scmp.ne.s32.totalorder %s2682_s28, %s2065_s0  ;;  %p2070_p4 = scmp.lt.u32.totalorder %s2682_s28, %s2730_s4 }
 0x3d2   : > { %p2071_p11 = scmp.lt.u32.totalorder %s2069_s21, %s2065_s0  ;;  %p2073_p3 = scmp.lt.u32.totalorder %s2065_s0, %s2682_s28 }
 0x3d3   : > { %p2067_p10 = pnand %p2066_p8, %p2251_p12 }
 0x3d4   : > { %p2072_p13 = por %p2071_p11, %p2070_p4 }
 0x3d5   : > { %p2068_p0 = pneg %p2067_p10 }
 0x3d6   : > { %p2074_p7 = por %p2073_p3, %p2072_p13 }
 0x3d8   : > { %p2075_p9 = pnand %p2074_p7, %p2068_p0 }
 0x3da   : > { %2078 = shalt.err (!%p2075_p9)
}
 0x3db   : > { %1886 = dma.vmem_to_hbm [thread:$0]  (%p2251_p12), %s2684_s14, 128, %s2682_s28, %s1558_s25  }
 0x3dc PF: > { %s1583_s8 = sand.u32 1, %s2113_s15   ;;  %p2759_p1 = scmp.ne.s32.totalorder %s2736_s22, 0 }
 0x3dd   : > { %p2760_p5 = scmp.ge.s32.totalorder %s2125_s18, 2  ;;  %s1584_s12 = scalar_lea.sflag [#allocation6], %s1583_s8 }
 0x3df   : > { %p1900_p2 = pnand %p2760_p5, %p2759_p1 }
 0x3e1   : > { %2108 = dma.done.wait (!%p1900_p2), %s1584_s12, 128  }
 0x3e2   : > { %2110 = vsyncadd (!%p1900_p2), %s1584_s12, 4294967168  ;;  %p20_p6 = scmp.ge.s32.totalorder %s2216_s27, 4   ;;  %s2761_s15 = smov %s2117_s16 }
 0x3e3   : > { %s2762_s16 = smov %s2121_s17  ;;  %s2763_s17 = smov %s2247_s24 }
 0x3e4   : > { %s2764_s18 = smov %s2216_s27  ;;  %22 = sbr.rel (!%p20_p6) target bundleno = 9 (0x9), region = 106 }
 0x3eb   :  { %1589 = vsyncpa [#allocation5], 1 }
 0x3ec   :  { %1591 = vsyncpa [#allocation5 + $0x1], 1 }
 0x3ed   :  { %1592 = vsyncpa [#allocation8], 1 }
 0x3ee   :  { %1594 = vsyncpa [#allocation8 + $0x1], 1 }
 0x3ef   :  { %1595 = vsyncpa [#allocation6], 1 }
 0x3f0   :  { %1597 = vsyncpa [#allocation6 + $0x1], 1 }

</bundles_post_ra>
